<compile_context>
chip_gen: v6e
topology: v6e:2x2x1
jax: 0.10.0
libtpu: 0.0.40
codegen_flags: <defaults>
</compile_context>

<pallas_src>
import functools

import jax
import jax.numpy as jnp
from jax import lax
from jax.experimental import pallas as pl
from jax.experimental.pallas import tpu as pltpu


def _full_spec(shape):
    nd = len(shape)
    return pl.BlockSpec(tuple(shape), lambda i, _nd=nd: (0,) * _nd)


# ------------------------------- fused kernel --------------------------------


def _fused_kernel(xs_ref, w1_ref, g1_ref, beta1_ref, w2_ref, g2_ref, beta2_ref,
                  o_ref, y1p_ref, *, eps):
    """Fused double_conv_hole forward (single program).

    xs_ref  : (2, 2, N, Hp/2, Wp/2, Cin)  stride-2 parity planes of the padded input,
              xs[ph, pw] == x_pad[:, ph::2, pw::2, :]
    w1_ref  : (9*Cin,  Cout) bf16  conv1 taps flattened (kh, kw, cin) row-major
    w2_ref  : (9*Cout, Cout) bf16  conv2 taps flattened (kh, kw, cout) row-major
    g*/beta*: (1, Cout) f32        BatchNorm affine params
    o_ref   : (N, Ho2, Wo2, Cout) f32
    y1p_ref : (N, Ho1+2, Wo1+2, Cout) f32 VMEM scratch (conv1 activation + zero halo)
    """
    N, Ho2, Wo2, Cout = o_ref.shape
    Ho1, Wo1 = y1p_ref.shape[1] - 2, y1p_ref.shape[2] - 2
    Cin = xs_ref.shape[-1]
    M1 = N * Ho1 * Wo1
    M2 = N * Ho2 * Wo2

    # ---- conv1: 3x3 / stride 2 / pad 1 as ONE im2col matmul (bias cancelled by BN) ----
    taps = []
    for kh in range(3):
        for kw in range(3):
            # padded-input row for output row oh is 2*oh + kh
            #   -> parity plane kh % 2, plane-row oh + kh // 2  (contiguous read)
            taps.append(xs_ref[kh % 2, kw % 2, :,
                               pl.ds(kh // 2, Ho1), pl.ds(kw // 2, Wo1), :])
    lhs1 = jnp.concatenate(taps, axis=-1).reshape(M1, 9 * Cin)
    y1 = jnp.dot(lhs1.astype(jnp.bfloat16), w1_ref[...],
                 preferred_element_type=jnp.float32)              # (M1, Cout)

    # ---- BN1 (training-mode batch stats, biased variance) + ReLU ----
    mean1 = jnp.sum(y1, axis=0, keepdims=True) * (1.0 / M1)
    c1 = y1 - mean1
    var1 = jnp.sum(c1 * c1, axis=0, keepdims=True) * (1.0 / M1)
    y1 = jnp.maximum(c1 * lax.rsqrt(var1 + eps) * g1_ref[...] + beta1_ref[...], 0.0)

    # ---- stash conv1 activation with a 1-pixel zero halo in VMEM (no HBM round trip) ----
    y1p_ref[...] = jnp.zeros_like(y1p_ref)
    y1p_ref[:, pl.ds(1, Ho1), pl.ds(1, Wo1), :] = y1.reshape(N, Ho1, Wo1, Cout)

    # ---- conv2: 3x3 / stride 1 / pad 1 / dilation 2 as ONE im2col matmul ----
    taps = []
    for kh in range(3):
        for kw in range(3):
            taps.append(y1p_ref[:, pl.ds(2 * kh, Ho2), pl.ds(2 * kw, Wo2), :])
    lhs2 = jnp.concatenate(taps, axis=-1).reshape(M2, 9 * Cout)
    y2 = jnp.dot(lhs2.astype(jnp.bfloat16), w2_ref[...],
                 preferred_element_type=jnp.float32)              # (M2, Cout)

    # ---- BN2 + ReLU ----
    mean2 = jnp.sum(y2, axis=0, keepdims=True) * (1.0 / M2)
    c2 = y2 - mean2
    var2 = jnp.sum(c2 * c2, axis=0, keepdims=True) * (1.0 / M2)
    y2 = jnp.maximum(c2 * lax.rsqrt(var2 + eps) * g2_ref[...] + beta2_ref[...], 0.0)

    o_ref[...] = y2.reshape(N, Ho2, Wo2, Cout).astype(o_ref.dtype)


# ------------------------------- host wrapper --------------------------------

_PARAMS = pltpu.CompilerParams(dimension_semantics=("arbitrary",))


def double_conv_hole_forward(x_nchw, params, eps=1e-5):
    """NCHW in / NCHW out, PyTorch training-mode BatchNorm semantics."""
    w1, b1, g1, be1, w2, b2, g2, be2 = params
    # Conv biases are exactly cancelled by the immediately-following training-mode
    # BatchNorm (batch-mean subtraction), so they are not fed to the kernel.
    del b1, b2

    x = jnp.transpose(x_nchw, (0, 2, 3, 1)).astype(jnp.float32)   # NCHW -> NHWC
    N, H, W, Cin = x.shape
    Cout = w1.shape[-1]
    assert H % 2 == 0 and W % 2 == 0, "even spatial dims assumed for the stride-2 parity split"

    Ho1, Wo1 = (H + 2 - 3) // 2 + 1, (W + 2 - 3) // 2 + 1         # conv1: pad 1, stride 2
    Ho2, Wo2 = Ho1 - 2, Wo1 - 2                                   # conv2: pad 1, dilation 2

    # pad=1 + stride-2 parity split as one cheap reshape/transpose (no nested stacks)
    xp = jnp.pad(x, ((0, 0), (1, 1), (1, 1), (0, 0)))
    xs = xp.reshape(N, (H + 2) // 2, 2, (W + 2) // 2, 2, Cin).transpose(2, 4, 0, 1, 3, 5)

    # conv weights as im2col matrices; bf16 MXU operands (f32 accumulation in-kernel)
    w1m = w1.reshape(9 * Cin, Cout).astype(jnp.bfloat16)
    w2m = w2.reshape(9 * Cout, Cout).astype(jnp.bfloat16)
    g1r = g1.reshape(1, Cout).astype(jnp.float32)
    be1r = be1.reshape(1, Cout).astype(jnp.float32)
    g2r = g2.reshape(1, Cout).astype(jnp.float32)
    be2r = be2.reshape(1, Cout).astype(jnp.float32)

    out_shape = jax.ShapeDtypeStruct((N, Ho2, Wo2, Cout), jnp.float32)
    args = (xs, w1m, g1r, be1r, w2m, g2r, be2r)
    y = pl.pallas_call(
        functools.partial(_fused_kernel, eps=eps),
        out_shape=out_shape,
        grid=(1,),
        in_specs=[_full_spec(a.shape) for a in args],
        out_specs=_full_spec(out_shape.shape),
        scratch_shapes=[pltpu.VMEM((N, Ho1 + 2, Wo1 + 2, Cout), jnp.float32)],
        compiler_params=_PARAMS,
    )(*args)

    return jnp.transpose(y, (0, 3, 1, 2))                         # NHWC -> NCHW


# ----------------------------- pure-JAX reference -----------------------------


def _ref_forward(x_nchw, params, eps=1e-5):
    w1, b1, g1, be1, w2, b2, g2, be2 = params
    x = jnp.transpose(x_nchw, (0, 2, 3, 1)).astype(jnp.float32)

    def bn_relu(t, g, b):
        m = jnp.mean(t, axis=(0, 1, 2), keepdims=True)
        v = jnp.mean((t - m) ** 2, axis=(0, 1, 2), keepdims=True)
        return jnp.maximum((t - m) / jnp.sqrt(v + eps) * g.reshape(1, 1, 1, -1)
                           + b.reshape(1, 1, 1, -1), 0.0)

    dn = ("NHWC", "HWIO", "NHWC")
    y = lax.conv_general_dilated(x, w1, window_strides=(2, 2), padding=((1, 1), (1, 1)),
                                 dimension_numbers=dn,
                                 precision=lax.Precision.HIGHEST) + b1.reshape(1, 1, 1, -1)
    y = bn_relu(y, g1, be1)
    y = lax.conv_general_dilated(y, w2, window_strides=(1, 1), padding=((1, 1), (1, 1)),
                                 rhs_dilation=(2, 2), dimension_numbers=dn,
                                 precision=lax.Precision.HIGHEST) + b2.reshape(1, 1, 1, -1)
    y = bn_relu(y, g2, be2)
    return jnp.transpose(y, (0, 3, 1, 2))


# ------------------------------------ main ------------------------------------

if __name__ == "__main__":
    key = jax.random.PRNGKey(0)
    keys = jax.random.split(key, 9)
    N, Cin, H, W = 2, 4, 16, 16
    Cout = 8

    x = jax.random.normal(keys[0], (N, Cin, H, W), jnp.float32)
    # deterministic synthetic params (HWIO conv weights, per-channel BN affine)
    w1 = 0.2 * jax.random.normal(keys[1], (3, 3, Cin, Cout), jnp.float32)
    b1 = 0.1 * jax.random.normal(keys[2], (Cout,), jnp.float32)
    g1 = 1.0 + 0.1 * jax.random.normal(keys[3], (Cout,), jnp.float32)
    be1 = 0.1 * jax.random.normal(keys[4], (Cout,), jnp.float32)
    w2 = 0.2 * jax.random.normal(keys[5], (3, 3, Cout, Cout), jnp.float32)
    b2 = 0.1 * jax.random.normal(keys[6], (Cout,), jnp.float32)
    g2 = 1.0 + 0.1 * jax.random.normal(keys[7], (Cout,), jnp.float32)
    be2 = 0.1 * jax.random.normal(keys[8], (Cout,), jnp.float32)
    params = (w1, b1, g1, be1, w2, b2, g2, be2)

    out = jax.block_until_ready(double_conv_hole_forward(x, params))
    assert out.shape == (N, Cout, H // 2 - 2, W // 2 - 2), out.shape

    ref = jax.block_until_ready(_ref_forward(x, params))
    err = float(jnp.max(jnp.abs(out - ref)))
    # tolerance admits the bf16 MXU operands (f32 accumulation); expected err ~2-3e-2
    if err > 5e-2:
        raise AssertionError(f"mismatch vs reference: max abs err {err}")
    print("KERNEL_OK")
</pallas_src>

<mosaic_0001>
module attributes {stable_mosaic.version = 11 : i64} {
  func.func @_fused_kernel(%arg0: i32, %arg1: memref<2x2x2x9x9x4xf32, #tpu.memory_space<vmem>>, %arg2: memref<36x8xbf16, #tpu.memory_space<vmem>>, %arg3: memref<1x8xf32, #tpu.memory_space<vmem>>, %arg4: memref<1x8xf32, #tpu.memory_space<vmem>>, %arg5: memref<72x8xbf16, #tpu.memory_space<vmem>>, %arg6: memref<1x8xf32, #tpu.memory_space<vmem>>, %arg7: memref<1x8xf32, #tpu.memory_space<vmem>>, %arg8: memref<2x6x6x8xf32, #tpu.memory_space<vmem>>, %arg9: memref<2x10x10x8xf32, #tpu.memory_space<vmem>>) attributes {dimension_semantics = [#tpu.dimension_semantics<arbitrary>], iteration_bounds = array<i64: 1>, scalar_prefetch = 0 : i64, scratch_operands = 1 : i64, tpu.core_type = #tpu.core_type<tc>, window_params = [{pipeline_mode = #tpu.pipeline_mode<synchronous>, transform_indices = @transform_0, window_bounds = array<i64: 2, 2, 2, 9, 9, 4>}, {pipeline_mode = #tpu.pipeline_mode<synchronous>, transform_indices = @transform_1, window_bounds = array<i64: 36, 8>}, {pipeline_mode = #tpu.pipeline_mode<synchronous>, transform_indices = @transform_2, window_bounds = array<i64: 1, 8>}, {pipeline_mode = #tpu.pipeline_mode<synchronous>, transform_indices = @transform_3, window_bounds = array<i64: 1, 8>}, {pipeline_mode = #tpu.pipeline_mode<synchronous>, transform_indices = @transform_4, window_bounds = array<i64: 72, 8>}, {pipeline_mode = #tpu.pipeline_mode<synchronous>, transform_indices = @transform_5, window_bounds = array<i64: 1, 8>}, {pipeline_mode = #tpu.pipeline_mode<synchronous>, transform_indices = @transform_6, window_bounds = array<i64: 1, 8>}, {pipeline_mode = #tpu.pipeline_mode<synchronous>, transform_indices = @transform_7, window_bounds = array<i64: 2, 6, 6, 8>}]} {
    %c0 = arith.constant 0 : index
    %c0_0 = arith.constant 0 : index
    %c0_1 = arith.constant 0 : index
    %c0_2 = arith.constant 0 : index
    %c0_3 = arith.constant 0 : index
    %c0_4 = arith.constant 0 : index
    %0 = vector.load %arg1[%c0, %c0_0, %c0_1, %c0_2, %c0_3, %c0_4] : memref<2x2x2x9x9x4xf32, #tpu.memory_space<vmem>>, vector<1x1x2x8x8x4xf32>
    %1 = vector.shape_cast %0 : vector<1x1x2x8x8x4xf32> to vector<2x8x8x4xf32>
    %c0_5 = arith.constant 0 : index
    %c1 = arith.constant 1 : index
    %c0_6 = arith.constant 0 : index
    %c0_7 = arith.constant 0 : index
    %c0_8 = arith.constant 0 : index
    %c0_9 = arith.constant 0 : index
    %2 = vector.load %arg1[%c0_5, %c1, %c0_6, %c0_7, %c0_8, %c0_9] : memref<2x2x2x9x9x4xf32, #tpu.memory_space<vmem>>, vector<1x1x2x8x8x4xf32>
    %3 = vector.shape_cast %2 : vector<1x1x2x8x8x4xf32> to vector<2x8x8x4xf32>
    %c0_10 = arith.constant 0 : index
    %c0_11 = arith.constant 0 : index
    %c0_12 = arith.constant 0 : index
    %c0_13 = arith.constant 0 : index
    %c1_14 = arith.constant 1 : index
    %c0_15 = arith.constant 0 : index
    %4 = vector.load %arg1[%c0_10, %c0_11, %c0_12, %c0_13, %c1_14, %c0_15] : memref<2x2x2x9x9x4xf32, #tpu.memory_space<vmem>>, vector<1x1x2x8x8x4xf32>
    %5 = vector.shape_cast %4 : vector<1x1x2x8x8x4xf32> to vector<2x8x8x4xf32>
    %c1_16 = arith.constant 1 : index
    %c0_17 = arith.constant 0 : index
    %c0_18 = arith.constant 0 : index
    %c0_19 = arith.constant 0 : index
    %c0_20 = arith.constant 0 : index
    %c0_21 = arith.constant 0 : index
    %6 = vector.load %arg1[%c1_16, %c0_17, %c0_18, %c0_19, %c0_20, %c0_21] : memref<2x2x2x9x9x4xf32, #tpu.memory_space<vmem>>, vector<1x1x2x8x8x4xf32>
    %7 = vector.shape_cast %6 : vector<1x1x2x8x8x4xf32> to vector<2x8x8x4xf32>
    %c1_22 = arith.constant 1 : index
    %c1_23 = arith.constant 1 : index
    %c0_24 = arith.constant 0 : index
    %c0_25 = arith.constant 0 : index
    %c0_26 = arith.constant 0 : index
    %c0_27 = arith.constant 0 : index
    %8 = vector.load %arg1[%c1_22, %c1_23, %c0_24, %c0_25, %c0_26, %c0_27] : memref<2x2x2x9x9x4xf32, #tpu.memory_space<vmem>>, vector<1x1x2x8x8x4xf32>
    %9 = vector.shape_cast %8 : vector<1x1x2x8x8x4xf32> to vector<2x8x8x4xf32>
    %c1_28 = arith.constant 1 : index
    %c0_29 = arith.constant 0 : index
    %c0_30 = arith.constant 0 : index
    %c0_31 = arith.constant 0 : index
    %c1_32 = arith.constant 1 : index
    %c0_33 = arith.constant 0 : index
    %10 = vector.load %arg1[%c1_28, %c0_29, %c0_30, %c0_31, %c1_32, %c0_33] : memref<2x2x2x9x9x4xf32, #tpu.memory_space<vmem>>, vector<1x1x2x8x8x4xf32>
    %11 = vector.shape_cast %10 : vector<1x1x2x8x8x4xf32> to vector<2x8x8x4xf32>
    %c0_34 = arith.constant 0 : index
    %c0_35 = arith.constant 0 : index
    %c0_36 = arith.constant 0 : index
    %c1_37 = arith.constant 1 : index
    %c0_38 = arith.constant 0 : index
    %c0_39 = arith.constant 0 : index
    %12 = vector.load %arg1[%c0_34, %c0_35, %c0_36, %c1_37, %c0_38, %c0_39] : memref<2x2x2x9x9x4xf32, #tpu.memory_space<vmem>>, vector<1x1x2x8x8x4xf32>
    %13 = vector.shape_cast %12 : vector<1x1x2x8x8x4xf32> to vector<2x8x8x4xf32>
    %c0_40 = arith.constant 0 : index
    %c1_41 = arith.constant 1 : index
    %c0_42 = arith.constant 0 : index
    %c1_43 = arith.constant 1 : index
    %c0_44 = arith.constant 0 : index
    %c0_45 = arith.constant 0 : index
    %14 = vector.load %arg1[%c0_40, %c1_41, %c0_42, %c1_43, %c0_44, %c0_45] : memref<2x2x2x9x9x4xf32, #tpu.memory_space<vmem>>, vector<1x1x2x8x8x4xf32>
    %15 = vector.shape_cast %14 : vector<1x1x2x8x8x4xf32> to vector<2x8x8x4xf32>
    %c0_46 = arith.constant 0 : index
    %c0_47 = arith.constant 0 : index
    %c0_48 = arith.constant 0 : index
    %c1_49 = arith.constant 1 : index
    %c1_50 = arith.constant 1 : index
    %c0_51 = arith.constant 0 : index
    %16 = vector.load %arg1[%c0_46, %c0_47, %c0_48, %c1_49, %c1_50, %c0_51] : memref<2x2x2x9x9x4xf32, #tpu.memory_space<vmem>>, vector<1x1x2x8x8x4xf32>
    %17 = vector.shape_cast %16 : vector<1x1x2x8x8x4xf32> to vector<2x8x8x4xf32>
    %18 = tpu.concatenate %1, %3, %5, %7, %9, %11, %13, %15, %17 in 3 : vector<2x8x8x4xf32>, vector<2x8x8x4xf32>, vector<2x8x8x4xf32>, vector<2x8x8x4xf32>, vector<2x8x8x4xf32>, vector<2x8x8x4xf32>, vector<2x8x8x4xf32>, vector<2x8x8x4xf32>, vector<2x8x8x4xf32> -> vector<2x8x8x36xf32>
    %19 = vector.shape_cast %18 : vector<2x8x8x36xf32> to vector<128x36xf32>
    %20 = arith.truncf %19 : vector<128x36xf32> to vector<128x36xbf16>
    %c0_52 = arith.constant 0 : index
    %c0_53 = arith.constant 0 : index
    %21 = vector.load %arg2[%c0_52, %c0_53] : memref<36x8xbf16, #tpu.memory_space<vmem>>, vector<36x8xbf16>
    %cst = arith.constant dense<0.000000e+00> : vector<128x8xf32>
    %22 = tpu.matmul %20, %21, %cst {dimension_numbers = #tpu.dot_dimension_numbers<[1], [0], [0], [1], [0, 0, 1, 1], [], []>} : vector<128x36xbf16>, vector<36x8xbf16>, vector<128x8xf32> -> vector<128x8xf32>
    %cst_54 = arith.constant dense<0.000000e+00> : vector<8xf32>
    %23 = vector.multi_reduction <add>, %22, %cst_54 [0] : vector<128x8xf32> to vector<8xf32>
    %24 = vector.shape_cast %23 : vector<8xf32> to vector<1x8xf32>
    %cst_55 = arith.constant 7.812500e-03 : f32
    %25 = vector.broadcast %cst_55 : f32 to vector<1x8xf32>
    %26 = arith.mulf %24, %25 : vector<1x8xf32>
    %27 = vector.broadcast %26 : vector<1x8xf32> to vector<128x8xf32>
    %28 = arith.subf %22, %27 : vector<128x8xf32>
    %29 = arith.mulf %28, %28 : vector<128x8xf32>
    %cst_56 = arith.constant dense<0.000000e+00> : vector<8xf32>
    %30 = vector.multi_reduction <add>, %29, %cst_56 [0] : vector<128x8xf32> to vector<8xf32>
    %31 = vector.shape_cast %30 : vector<8xf32> to vector<1x8xf32>
    %cst_57 = arith.constant 7.812500e-03 : f32
    %32 = vector.broadcast %cst_57 : f32 to vector<1x8xf32>
    %33 = arith.mulf %31, %32 : vector<1x8xf32>
    %cst_58 = arith.constant 9.99999974E-6 : f32
    %34 = vector.broadcast %cst_58 : f32 to vector<1x8xf32>
    %35 = arith.addf %33, %34 : vector<1x8xf32>
    %36 = math.rsqrt %35 : vector<1x8xf32>
    %37 = vector.broadcast %36 : vector<1x8xf32> to vector<128x8xf32>
    %38 = arith.mulf %28, %37 : vector<128x8xf32>
    %c0_59 = arith.constant 0 : index
    %c0_60 = arith.constant 0 : index
    %39 = vector.load %arg3[%c0_59, %c0_60] : memref<1x8xf32, #tpu.memory_space<vmem>>, vector<1x8xf32>
    %40 = vector.broadcast %39 : vector<1x8xf32> to vector<128x8xf32>
    %41 = arith.mulf %38, %40 : vector<128x8xf32>
    %c0_61 = arith.constant 0 : index
    %c0_62 = arith.constant 0 : index
    %42 = vector.load %arg4[%c0_61, %c0_62] : memref<1x8xf32, #tpu.memory_space<vmem>>, vector<1x8xf32>
    %43 = vector.broadcast %42 : vector<1x8xf32> to vector<128x8xf32>
    %44 = arith.addf %41, %43 : vector<128x8xf32>
    %cst_63 = arith.constant 0.000000e+00 : f32
    %45 = vector.broadcast %cst_63 : f32 to vector<128x8xf32>
    %46 = arith.maximumf %44, %45 : vector<128x8xf32>
    %cst_64 = arith.constant 0.000000e+00 : f32
    %47 = vector.broadcast %cst_64 : f32 to vector<2x10x10x8xf32>
    %c0_65 = arith.constant 0 : index
    %c0_66 = arith.constant 0 : index
    %c0_67 = arith.constant 0 : index
    %c0_68 = arith.constant 0 : index
    %48 = vector.load %arg9[%c0_65, %c0_66, %c0_67, %c0_68] : memref<2x10x10x8xf32, #tpu.memory_space<vmem>>, vector<2x10x10x8xf32>
    tpu.vector_store %arg9[%c0_65, %c0_66, %c0_67, %c0_68], %47 {strides = array<i32>} : memref<2x10x10x8xf32, #tpu.memory_space<vmem>>, vector<2x10x10x8xf32>,
    %49 = vector.shape_cast %46 : vector<128x8xf32> to vector<2x8x8x8xf32>
    %c0_69 = arith.constant 0 : index
    %c1_70 = arith.constant 1 : index
    %c1_71 = arith.constant 1 : index
    %c0_72 = arith.constant 0 : index
    %50 = vector.load %arg9[%c0_69, %c1_70, %c1_71, %c0_72] : memref<2x10x10x8xf32, #tpu.memory_space<vmem>>, vector<2x8x8x8xf32>
    tpu.vector_store %arg9[%c0_69, %c1_70, %c1_71, %c0_72], %49 {strides = array<i32>} : memref<2x10x10x8xf32, #tpu.memory_space<vmem>>, vector<2x8x8x8xf32>,
    %c0_73 = arith.constant 0 : index
    %c0_74 = arith.constant 0 : index
    %c0_75 = arith.constant 0 : index
    %c0_76 = arith.constant 0 : index
    %51 = vector.load %arg9[%c0_73, %c0_74, %c0_75, %c0_76] : memref<2x10x10x8xf32, #tpu.memory_space<vmem>>, vector<2x6x6x8xf32>
    %c0_77 = arith.constant 0 : index
    %c0_78 = arith.constant 0 : index
    %c2 = arith.constant 2 : index
    %c0_79 = arith.constant 0 : index
    %52 = vector.load %arg9[%c0_77, %c0_78, %c2, %c0_79] : memref<2x10x10x8xf32, #tpu.memory_space<vmem>>, vector<2x6x6x8xf32>
    %c0_80 = arith.constant 0 : index
    %c0_81 = arith.constant 0 : index
    %c4 = arith.constant 4 : index
    %c0_82 = arith.constant 0 : index
    %53 = vector.load %arg9[%c0_80, %c0_81, %c4, %c0_82] : memref<2x10x10x8xf32, #tpu.memory_space<vmem>>, vector<2x6x6x8xf32>
    %c0_83 = arith.constant 0 : index
    %c2_84 = arith.constant 2 : index
    %c0_85 = arith.constant 0 : index
    %c0_86 = arith.constant 0 : index
    %54 = vector.load %arg9[%c0_83, %c2_84, %c0_85, %c0_86] : memref<2x10x10x8xf32, #tpu.memory_space<vmem>>, vector<2x6x6x8xf32>
    %c0_87 = arith.constant 0 : index
    %c2_88 = arith.constant 2 : index
    %c2_89 = arith.constant 2 : index
    %c0_90 = arith.constant 0 : index
    %55 = vector.load %arg9[%c0_87, %c2_88, %c2_89, %c0_90] : memref<2x10x10x8xf32, #tpu.memory_space<vmem>>, vector<2x6x6x8xf32>
    %c0_91 = arith.constant 0 : index
    %c2_92 = arith.constant 2 : index
    %c4_93 = arith.constant 4 : index
    %c0_94 = arith.constant 0 : index
    %56 = vector.load %arg9[%c0_91, %c2_92, %c4_93, %c0_94] : memref<2x10x10x8xf32, #tpu.memory_space<vmem>>, vector<2x6x6x8xf32>
    %c0_95 = arith.constant 0 : index
    %c4_96 = arith.constant 4 : index
    %c0_97 = arith.constant 0 : index
    %c0_98 = arith.constant 0 : index
    %57 = vector.load %arg9[%c0_95, %c4_96, %c0_97, %c0_98] : memref<2x10x10x8xf32, #tpu.memory_space<vmem>>, vector<2x6x6x8xf32>
    %c0_99 = arith.constant 0 : index
    %c4_100 = arith.constant 4 : index
    %c2_101 = arith.constant 2 : index
    %c0_102 = arith.constant 0 : index
    %58 = vector.load %arg9[%c0_99, %c4_100, %c2_101, %c0_102] : memref<2x10x10x8xf32, #tpu.memory_space<vmem>>, vector<2x6x6x8xf32>
    %c0_103 = arith.constant 0 : index
    %c4_104 = arith.constant 4 : index
    %c4_105 = arith.constant 4 : index
    %c0_106 = arith.constant 0 : index
    %59 = vector.load %arg9[%c0_103, %c4_104, %c4_105, %c0_106] : memref<2x10x10x8xf32, #tpu.memory_space<vmem>>, vector<2x6x6x8xf32>
    %60 = tpu.concatenate %51, %52, %53, %54, %55, %56, %57, %58, %59 in 3 : vector<2x6x6x8xf32>, vector<2x6x6x8xf32>, vector<2x6x6x8xf32>, vector<2x6x6x8xf32>, vector<2x6x6x8xf32>, vector<2x6x6x8xf32>, vector<2x6x6x8xf32>, vector<2x6x6x8xf32>, vector<2x6x6x8xf32> -> vector<2x6x6x72xf32>
    %61 = vector.shape_cast %60 : vector<2x6x6x72xf32> to vector<72x72xf32>
    %62 = arith.truncf %61 : vector<72x72xf32> to vector<72x72xbf16>
    %c0_107 = arith.constant 0 : index
    %c0_108 = arith.constant 0 : index
    %63 = vector.load %arg5[%c0_107, %c0_108] : memref<72x8xbf16, #tpu.memory_space<vmem>>, vector<72x8xbf16>
    %cst_109 = arith.constant dense<0.000000e+00> : vector<72x8xf32>
    %64 = tpu.matmul %62, %63, %cst_109 {dimension_numbers = #tpu.dot_dimension_numbers<[1], [0], [0], [1], [0, 0, 1, 1], [], []>} : vector<72x72xbf16>, vector<72x8xbf16>, vector<72x8xf32> -> vector<72x8xf32>
    %cst_110 = arith.constant dense<0.000000e+00> : vector<8xf32>
    %65 = vector.multi_reduction <add>, %64, %cst_110 [0] : vector<72x8xf32> to vector<8xf32>
    %66 = vector.shape_cast %65 : vector<8xf32> to vector<1x8xf32>
    %cst_111 = arith.constant 0.013888889 : f32
    %67 = vector.broadcast %cst_111 : f32 to vector<1x8xf32>
    %68 = arith.mulf %66, %67 : vector<1x8xf32>
    %69 = vector.broadcast %68 : vector<1x8xf32> to vector<72x8xf32>
    %70 = arith.subf %64, %69 : vector<72x8xf32>
    %71 = arith.mulf %70, %70 : vector<72x8xf32>
    %cst_112 = arith.constant dense<0.000000e+00> : vector<8xf32>
    %72 = vector.multi_reduction <add>, %71, %cst_112 [0] : vector<72x8xf32> to vector<8xf32>
    %73 = vector.shape_cast %72 : vector<8xf32> to vector<1x8xf32>
    %cst_113 = arith.constant 0.013888889 : f32
    %74 = vector.broadcast %cst_113 : f32 to vector<1x8xf32>
    %75 = arith.mulf %73, %74 : vector<1x8xf32>
    %cst_114 = arith.constant 9.99999974E-6 : f32
    %76 = vector.broadcast %cst_114 : f32 to vector<1x8xf32>
    %77 = arith.addf %75, %76 : vector<1x8xf32>
    %78 = math.rsqrt %77 : vector<1x8xf32>
    %79 = vector.broadcast %78 : vector<1x8xf32> to vector<72x8xf32>
    %80 = arith.mulf %70, %79 : vector<72x8xf32>
    %c0_115 = arith.constant 0 : index
    %c0_116 = arith.constant 0 : index
    %81 = vector.load %arg6[%c0_115, %c0_116] : memref<1x8xf32, #tpu.memory_space<vmem>>, vector<1x8xf32>
    %82 = vector.broadcast %81 : vector<1x8xf32> to vector<72x8xf32>
    %83 = arith.mulf %80, %82 : vector<72x8xf32>
    %c0_117 = arith.constant 0 : index
    %c0_118 = arith.constant 0 : index
    %84 = vector.load %arg7[%c0_117, %c0_118] : memref<1x8xf32, #tpu.memory_space<vmem>>, vector<1x8xf32>
    %85 = vector.broadcast %84 : vector<1x8xf32> to vector<72x8xf32>
    %86 = arith.addf %83, %85 : vector<72x8xf32>
    %cst_119 = arith.constant 0.000000e+00 : f32
    %87 = vector.broadcast %cst_119 : f32 to vector<72x8xf32>
    %88 = arith.maximumf %86, %87 : vector<72x8xf32>
    %89 = vector.shape_cast %88 : vector<72x8xf32> to vector<2x6x6x8xf32>
    %c0_120 = arith.constant 0 : index
    %c0_121 = arith.constant 0 : index
    %c0_122 = arith.constant 0 : index
    %c0_123 = arith.constant 0 : index
    %90 = vector.load %arg8[%c0_120, %c0_121, %c0_122, %c0_123] : memref<2x6x6x8xf32, #tpu.memory_space<vmem>>, vector<2x6x6x8xf32>
    tpu.vector_store %arg8[%c0_120, %c0_121, %c0_122, %c0_123], %89 {strides = array<i32>} : memref<2x6x6x8xf32, #tpu.memory_space<vmem>>, vector<2x6x6x8xf32>,
    return
  }
  func.func @transform_0(%arg0: i32) -> (i32, i32, i32, i32, i32, i32) {
    %c0_i32 = arith.constant 0 : i32
    %c0_i32_0 = arith.constant 0 : i32
    %c0_i32_1 = arith.constant 0 : i32
    %c0_i32_2 = arith.constant 0 : i32
    %c0_i32_3 = arith.constant 0 : i32
    %c0_i32_4 = arith.constant 0 : i32
    %c0_i32_5 = arith.constant 0 : i32
    return %c0_i32, %c0_i32_0, %c0_i32_1, %c0_i32_2, %c0_i32_3, %c0_i32_4 : i32, i32, i32, i32, i32, i32
  }
  func.func @transform_1(%arg0: i32) -> (i32, i32) {
    %c0_i32 = arith.constant 0 : i32
    %c0_i32_0 = arith.constant 0 : i32
    %c0_i32_1 = arith.constant 0 : i32
    return %c0_i32, %c0_i32_0 : i32, i32
  }
  func.func @transform_2(%arg0: i32) -> (i32, i32) {
    %c0_i32 = arith.constant 0 : i32
    %c0_i32_0 = arith.constant 0 : i32
    %c0_i32_1 = arith.constant 0 : i32
    return %c0_i32, %c0_i32_0 : i32, i32
  }
  func.func @transform_3(%arg0: i32) -> (i32, i32) {
    %c0_i32 = arith.constant 0 : i32
    %c0_i32_0 = arith.constant 0 : i32
    %c0_i32_1 = arith.constant 0 : i32
    return %c0_i32, %c0_i32_0 : i32, i32
  }
  func.func @transform_4(%arg0: i32) -> (i32, i32) {
    %c0_i32 = arith.constant 0 : i32
    %c0_i32_0 = arith.constant 0 : i32
    %c0_i32_1 = arith.constant 0 : i32
    return %c0_i32, %c0_i32_0 : i32, i32
  }
  func.func @transform_5(%arg0: i32) -> (i32, i32) {
    %c0_i32 = arith.constant 0 : i32
    %c0_i32_0 = arith.constant 0 : i32
    %c0_i32_1 = arith.constant 0 : i32
    return %c0_i32, %c0_i32_0 : i32, i32
  }
  func.func @transform_6(%arg0: i32) -> (i32, i32) {
    %c0_i32 = arith.constant 0 : i32
    %c0_i32_0 = arith.constant 0 : i32
    %c0_i32_1 = arith.constant 0 : i32
    return %c0_i32, %c0_i32_0 : i32, i32
  }
  func.func @transform_7(%arg0: i32) -> (i32, i32, i32, i32) {
    %c0_i32 = arith.constant 0 : i32
    %c0_i32_0 = arith.constant 0 : i32
    %c0_i32_1 = arith.constant 0 : i32
    %c0_i32_2 = arith.constant 0 : i32
    %c0_i32_3 = arith.constant 0 : i32
    return %c0_i32, %c0_i32_0, %c0_i32_1, %c0_i32_2 : i32, i32, i32, i32
  }
}

</mosaic_0001>

<bundles_post_ra>
// kernel: tpu_custom_call.1
= control target key start
LH: loop header
LB: loop body
LE: loop exit
PB: predicated region body
PF: predicated region fallthrough
CT: control target
= control target key end

     0   :  { %s3386_s17 = smov 8   ;;  %s3387_s18 = smov 4   ;;  %vm877_vm0 = vcmask 1041408   ;;  %vm688_vm1 = vcmask 31744   ;;  %vm705_vm2 = vcmask 64512   ;;  %vm722_vm3 = vcmask 97280   ;;  %s4814_s0 = inlined_call_operand.vmem [shape: f32[2,2,2,9,9,4], index: 0, kind: input, shape index: {}]   ;;  %s4815_s1 = inlined_call_operand.vmem [shape: bf16[36,8], index: 1, kind: input, shape index: {}]   ;;  %s4816_s2 = inlined_call_operand.vmem [shape: f32[1,8], index: 2, kind: input, shape index: {}]   ;;  %s4817_s3 = inlined_call_operand.vmem [shape: f32[1,8], index: 3, kind: input, shape index: {}]   ;;  %s4818_s4 = inlined_call_operand.vmem [shape: bf16[72,8], index: 4, kind: input, shape index: {}]   ;;  %s4819_s5 = inlined_call_operand.vmem [shape: f32[1,8], index: 5, kind: input, shape index: {}]   ;;  %s4820_s6 = inlined_call_operand.vmem [shape: f32[1,8], index: 6, kind: input, shape index: {}]   ;;  %s4821_s7 = inlined_call_operand.vmem [shape: f32[2,6,6,8], index: 7, kind: output, shape index: {}]  }
   0x1   :  { %v60_v0 = vld [vmem:[%s4814_s0 + $0x1] sm:$0xff]  ;;  %v3447_v1 = vld [vmem:[%s4814_s0 + $0x11] sm:$0xff]  ;;  %s3388_s12 = smov 12   ;;  %s3389_s23 = smov 16   ;;  %vm739_vm4 = vcmask 130048   ;;  %vm756_vm5 = vcmask 162816  }
   0x2   :  { %v2818_v2 = vld [vmem:[%s4814_s0 + $0x120] sm:$0xff]  ;;  %v3064_v3 = vpack.i.bf16 %v3447_v1, %v60_v0  ;;  %v2819_v4 = vld [vmem:[%s4814_s0 + $0x130] sm:$0xff]  ;;  %s3390_s9 = smov 20   ;;  %s3391_s13 = smov 24   ;;  %v3375_v51 = vld [vmem:[%s4815_s1 + $0x8] sm:$0xff]   ;;  %vm773_vm6 = vcmask 195584  }
   0x3   :  { %v3459_v5 = vld [vmem:[%s4814_s0 + $0x21] sm:$0xff]  ;;  %v3464_v6 = vld [vmem:[%s4814_s0 + $0x31] sm:$0xff]  ;;  %v3054_v7 = vpack.i.bf16 %v2819_v4, %v2818_v2  ;;  %s3392_s16 = smov 28   ;;  %s3393_s26 = smov 32   ;;  %vm790_vm7 = vcmask 228352   ;;  %vm807_vm8 = vcmask 261120  }
   0x4   :  { %v2820_v8 = vld [vmem:[%s4814_s0 + $0x140] sm:$0xff]  ;;  %v2821_v9 = vld [vmem:[%s4814_s0 + $0x150] sm:$0xff]  ;;  %3065 = vrot.lane.b32.xlu1 %v3064_v3, %s3386_s17  ;;  %v3069_v10 = vpack.i.bf16 %v3464_v6, %v3459_v5  ;;  %v3124_v41 = vpack.i.bf16 %v3459_v5, %v3447_v1  ;;  %vm852_vm9 = vcmask 293888   ;;  %vm1167_vm10 = vcmask 58368   ;;  %s3396_s8 = smov 64   ;;  %s3397_s10 = smov 56  }
   0x5   :  { %3055 = vrot.lane.b32.xlu0 %v3054_v7, %s3387_s18  ;;  %v3059_v11 = vpack.i.bf16 %v2821_v9, %v2820_v8  ;;  %v2836_v12 = vld [vmem:[%s4814_s0 + $0x260] sm:$0xff]  ;;  %v2837_v13 = vld [vmem:[%s4814_s0 + $0x270] sm:$0xff]  ;;  %v3114_v38 = vpack.i.bf16 %v2820_v8, %v2819_v4  ;;  %vm2241_vm11 = vcmask 1043456   ;;  %vm3399_vm12 = vmmov 0  }
   0x6   :  { %v2834_v14 = vld [vmem:[%s4814_s0 + $0x240] sm:$0xff]  ;;  %v2835_v15 = vld [vmem:[%s4814_s0 + $0x250] sm:$0xff]  ;;  %v3079_v16 = vpack.i.bf16 %v2837_v13, %v2836_v12  ;;  %vm1766_vm13 = vcmask 326656   ;;  %vm1779_vm14 = vcmask 392192   ;;  %vm1792_vm15 = vcmask 457728  }
   0x7   :  { %v3074_v17 = vpack.i.bf16 %v2835_v15, %v2834_v14  ;;  %v2852_v18 = vld [vmem:[%s4814_s0 + $0x380] sm:$0xff]  ;;  %v2853_v19 = vld [vmem:[%s4814_s0 + $0x390] sm:$0xff] }
   0x8   :  { %3070 = vrot.lane.b32.xlu1 %v3069_v10, %s3386_s17  ;;  %v2850_v20 = vld [vmem:[%s4814_s0 + $0x360] sm:$0xff]  ;;  %v2851_v21 = vld [vmem:[%s4814_s0 + $0x370] sm:$0xff]  ;;  %v3089_v22 = vpack.i.bf16 %v2853_v19, %v2852_v18 }
   0x9   :  { %3060 = vrot.lane.b32.xlu0 %v3059_v11, %s3387_s18  ;;  %v3084_v23 = vpack.i.bf16 %v2851_v21, %v2850_v20  ;;  %v2868_v24 = vld [vmem:[%s4814_s0 + $0x261] sm:$0xff]  ;;  %v2869_v25 = vld [vmem:[%s4814_s0 + $0x271] sm:$0xff]  ;;  %v3374_v50 = vld [vmem:[%s4815_s1 + $0x10] ss:$0 sps:$4 sm:$0x33]  }
   0xa   :  { %v2866_v26 = vld [vmem:[%s4814_s0 + $0x241] sm:$0xff]  ;;  %v2867_v27 = vld [vmem:[%s4814_s0 + $0x251] sm:$0xff]  ;;  %v3099_v28 = vpack.i.bf16 %v2869_v25, %v2868_v24  ;;  %3038 = vmatprep.subr.msk.bf16.mxu0 %vm877_vm0, %v3374_v50  ;;  %v879_v56 = vsel %vm877_vm0, %v3374_v50, 0  ;;  %vm1805_vm0 = vcmask 523264  }
   0xb   :  { %v3094_v29 = vpack.i.bf16 %v2867_v27, %v2866_v26  ;;  %v3521_v30 = vld [vmem:[%s4814_s0 + $0x30] sm:$0xff]  ;;  %v3526_v31 = vld [vmem:[%s4814_s0 + $0x40] sm:$0xff]  ;;  %2977 = vmatpush3.bf16.msra.mxu0 %v879_v56 }
   0xc   :  { %3080 = vrot.lane.b32.xlu1 %v3079_v16, %s3388_s12  ;;  %v3531_v32 = vld [vmem:[%s4814_s0 + $0x10] sm:$0xff]  ;;  %v3536_v33 = vld [vmem:[%s4814_s0 + $0x20] sm:$0xff]  ;;  %v3109_v34 = vpack.i.bf16 %v3526_v31, %v3521_v30  ;;  %2978 = vmatprep.subr.bf16.mxu0 %v3375_v51 }
   0xd   :  { %3075 = vrot.lane.b32.xlu0 %v3074_v17, %s3388_s12  ;;  %v3104_v35 = vpack.i.bf16 %v3536_v33, %v3531_v32  ;;  %v2901_v36 = vld [vmem:[%s4814_s0 + $0x160] sm:$0xff]  ;;  %v3552_v39 = vld [vmem:[%s4814_s0 + $0x170] sm:$0xff] }
   0xe   :  { %v3119_v37 = vpack.i.bf16 %v2901_v36, %v2821_v9  ;;  %v3129_v40 = vpack.i.bf16 %v3552_v39, %v2901_v36  ;;  %v3562_v42 = vld [vmem:[%s4814_s0 + $0x180] sm:$0xff]  ;;  %v3567_v43 = vld [vmem:[%s4814_s0 + $0x190] sm:$0xff] }
   0xf   :  { %v2917_v44 = vld [vmem:[%s4814_s0 + $0x41] sm:$0xff]  ;;  %v3139_v45 = vpack.i.bf16 %v3567_v43, %v3562_v42  ;;  %v3585_v48 = vld [vmem:[%s4814_s0 + $0x71] sm:$0xff]  ;;  %2979 = vmatpush3.bf16.msra.mxu0 %v3375_v51  ;;  %v3194_v18 = vpack.i.bf16 %v3562_v42, %v3552_v39 }
  0x10   :  { %3090 = vrot.lane.b32.xlu1 %v3089_v22, %s3389_s23  ;;  %v3134_v46 = vpack.i.bf16 %v2917_v44, %v3464_v6  ;;  %v3580_v47 = vld [vmem:[%s4814_s0 + $0x61] sm:$0xff]  ;;  %v3590_v49 = vld [vmem:[%s4814_s0 + $0x51] sm:$0xff] }
  0x11   :  { %3085 = vrot.lane.b32.xlu0 %v3084_v23, %s3389_s23  ;;  %v3149_v52 = vpack.i.bf16 %v3585_v48, %v3580_v47  ;;  %v3144_v53 = vpack.i.bf16 %v3590_v49, %v2917_v44  ;;  %v2840_v54 = vld [vmem:[%s4814_s0 + $0x2a0] sm:$0xff]  ;;  %v2841_v55 = vld [vmem:[%s4814_s0 + $0x2b0] sm:$0xff]  ;;  %v3204_v22 = vpack.i.bf16 %v3580_v47, %v3590_v49 }
  0x12   :  { %v2838_v57 = vld [vmem:[%s4814_s0 + $0x280] sm:$0xff]  ;;  %v2839_v58 = vld [vmem:[%s4814_s0 + $0x290] sm:$0xff]  ;;  %v3159_v60 = vpack.i.bf16 %v2841_v55, %v2840_v54 }
  0x13   :  { %v3376_v59 = vld [vmem:[%s4815_s1] sm:$0xff]   ;;  %v3154_v61 = vpack.i.bf16 %v2839_v58, %v2838_v57  ;;  %v2857_v63 = vld [vmem:[%s4814_s0 + $0x3d0] sm:$0xff] }
  0x14   :  { %3100 = vrot.lane.b32.xlu1 %v3099_v28, %s3390_s9  ;;  %v2856_v62 = vld [vmem:[%s4814_s0 + $0x3c0] sm:$0xff]  ;;  %v2855_v1 = vld [vmem:[%s4814_s0 + $0x3b0] sm:$0xff]  ;;  %2980 = vmatprep.subr.bf16.mxu0 %v3376_v59 }
  0x15   :  { %3095 = vrot.lane.b32.xlu0 %v3094_v29, %s3390_s9  ;;  %v2854_v0 = vld [vmem:[%s4814_s0 + $0x3a0] sm:$0xff]  ;;  %v3169_v2 = vpack.i.bf16 %v2857_v63, %v2856_v62  ;;  %v2873_v5 = vld [vmem:[%s4814_s0 + $0x2b1] sm:$0xff]  ;;  %2981 = vmatpush3.bf16.msra.mxu0 %v3376_v59 }
  0x16   :  { %v3164_v3 = vpack.i.bf16 %v2855_v1, %v2854_v0  ;;  %v2872_v4 = vld [vmem:[%s4814_s0 + $0x2a1] sm:$0xff]  ;;  %v2871_v7 = vld [vmem:[%s4814_s0 + $0x291] sm:$0xff] }
  0x17   :  { %v2870_v6 = vld [vmem:[%s4814_s0 + $0x281] sm:$0xff]  ;;  %v3179_v8 = vpack.i.bf16 %v2873_v5, %v2872_v4  ;;  %v3651_v10 = vld [vmem:[%s4814_s0 + $0x70] sm:$0xff] }
  0x18   :  { %3110 = vrot.lane.b32.xlu1 %v3109_v34, %s3391_s13  ;;  %v3174_v9 = vpack.i.bf16 %v2871_v7, %v2870_v6  ;;  %v2889_v11 = vld [vmem:[%s4814_s0 + $0x80] sm:$0xff]  ;;  %v3659_v12 = vld [vmem:[%s4814_s0 + $0x50] sm:$0xff] }
  0x19   :  { %3105 = vrot.lane.b32.xlu0 %v3104_v35, %s3391_s13  ;;  %v3664_v13 = vld [vmem:[%s4814_s0 + $0x60] sm:$0xff]  ;;  %v3189_v14 = vpack.i.bf16 %v2889_v11, %v3651_v10  ;;  %v2826_v19 = vld [vmem:[%s4814_s0 + $0x1b0] sm:$0xff] }
  0x1a   :  { %v3184_v15 = vpack.i.bf16 %v3664_v13, %v3659_v12  ;;  %v2905_v16 = vld [vmem:[%s4814_s0 + $0x1a0] sm:$0xff]  ;;  %v2828_v23 = vld [vmem:[%s4814_s0 + $0x1d0] sm:$0xff] }
  0x1b   :  { %v3199_v17 = vpack.i.bf16 %v2905_v16, %v3567_v43  ;;  %v2827_v20 = vld [vmem:[%s4814_s0 + $0x1c0] sm:$0xff]  ;;  %v70_v28 = vld [vmem:[%s4814_s0 + $0xb1] sm:$0xff] }
  0x1c   :  { %3120 = vrot.lane.b32.xlu1 %v3119_v37, %s3392_s16  ;;  %v3209_v21 = vpack.i.bf16 %v2827_v20, %v2826_v19  ;;  %v2829_v24 = vld [vmem:[%s4814_s0 + $0x1e0] sm:$0xff]  ;;  %v68_v34 = vld [vmem:[%s4814_s0 + $0x91] sm:$0xff]  ;;  %v3274_v0 = vpack.i.bf16 %v2828_v23, %v2827_v20 }
  0x1d   :  { %3115 = vrot.lane.b32.xlu0 %v3114_v38, %s3392_s16  ;;  %v2921_v25 = vld [vmem:[%s4814_s0 + $0x81] sm:$0xff]  ;;  %v3219_v26 = vpack.i.bf16 %v2829_v24, %v2828_v23  ;;  %v2844_v38 = vld [vmem:[%s4814_s0 + $0x2f0] sm:$0xff] }
  0x1e   :  { %v3214_v27 = vpack.i.bf16 %v2921_v25, %v3585_v48  ;;  %v71_v29 = vld [vmem:[%s4814_s0 + $0xc1] sm:$0xff]  ;;  %v2860_v44 = vld [vmem:[%s4814_s0 + $0x410] sm:$0xff] }
  0x1f   :  { %v69_v35 = vld [vmem:[%s4814_s0 + $0xa1] sm:$0xff]  ;;  %v3229_v36 = vpack.i.bf16 %v71_v29, %v70_v28  ;;  %v2876_v50 = vld [vmem:[%s4814_s0 + $0x2f1] sm:$0xff] }
  0x20   :  { %3130 = vrot.lane.b32.xlu1 %v3129_v40, %s3387_s18  ;;  %v3224_v37 = vpack.i.bf16 %v69_v35, %v68_v34  ;;  %v2845_v39 = vld [vmem:[%s4814_s0 + $0x300] sm:$0xff]  ;;  %v2842_v40 = vld [vmem:[%s4814_s0 + $0x2d0] sm:$0xff] }
  0x21   :  { %3125 = vrot.lane.b32.xlu0 %v3124_v41, %s3393_s26  ;;  %v2843_v41 = vld [vmem:[%s4814_s0 + $0x2e0] sm:$0xff]  ;;  %v3239_v42 = vpack.i.bf16 %v2845_v39, %v2844_v38  ;;  %v3765_v57 = vld [vmem:[%s4814_s0 + $0xd0] sm:$0xff] }
  0x22   :  { %v3234_v43 = vpack.i.bf16 %v2843_v41, %v2842_v40  ;;  %v2859_v47 = vld [vmem:[%s4814_s0 + $0x400] sm:$0xff]  ;;  %v3775_v59 = vld [vmem:[%s4814_s0 + $0xb0] sm:$0xff] }
  0x23   :  { %v2877_v51 = vld [vmem:[%s4814_s0 + $0x301] sm:$0xff]  ;;  %v2909_v62 = vld [vmem:[%s4814_s0 + $0x1f0] sm:$0xff] }
  0x24   :  { %3140 = vrot.lane.b32.xlu1 %v3139_v45, %s3387_s18  ;;  %v2861_v45 = vld [vmem:[%s4814_s0 + $0x420] sm:$0xff]  ;;  %v3259_v54 = vpack.i.bf16 %v2877_v51, %v2876_v50  ;;  %v3279_v63 = vpack.i.bf16 %v2909_v62, %v2829_v24  ;;  %v2832_v4 = vld [vmem:[%s4814_s0 + $0x210] sm:$0xff] }
  0x25   :  { %3135 = vrot.lane.b32.xlu0 %v3134_v46, %s3393_s26  ;;  %v2858_v46 = vld [vmem:[%s4814_s0 + $0x3f0] sm:$0xff]  ;;  %v3249_v48 = vpack.i.bf16 %v2861_v45, %v2860_v44  ;;  %v3760_v56 = vld [vmem:[%s4814_s0 + $0xc0] sm:$0xff] }
  0x26   :  { %v3244_v49 = vpack.i.bf16 %v2859_v47, %v2858_v46  ;;  %v3770_v58 = vld [vmem:[%s4814_s0 + $0xa0] sm:$0xff]  ;;  %v2925_v6 = vld [vmem:[%s4814_s0 + $0xd1] sm:$0xff] }
  0x27   :  { %v3791_v1 = vld [vmem:[%s4814_s0 + $0x200] sm:$0xff]  ;;  %v2846_v19 = vld [vmem:[%s4814_s0 + $0x310] sm:$0xff] }
  0x28   :  { %3150 = vrot.lane.b32.xlu1 %v3149_v52, %s3386_s17  ;;  %v2874_v52 = vld [vmem:[%s4814_s0 + $0x2d1] sm:$0xff]  ;;  %v2833_v5 = vld [vmem:[%s4814_s0 + $0x220] sm:$0xff] }
  0x29   :  { %3145 = vrot.lane.b32.xlu0 %v3144_v53, %s3386_s17  ;;  %v2875_v53 = vld [vmem:[%s4814_s0 + $0x2e1] sm:$0xff]  ;;  %v3299_v7 = vpack.i.bf16 %v2833_v5, %v2832_v4  ;;  %v2864_v23 = vld [vmem:[%s4814_s0 + $0x450] sm:$0xff] }
  0x2a   :  { %v3254_v55 = vpack.i.bf16 %v2875_v53, %v2874_v52  ;;  %v75_v11 = vld [vmem:[%s4814_s0 + $0x101] sm:$0xff]  ;;  %v2862_v25 = vld [vmem:[%s4814_s0 + $0x430] sm:$0xff] }
  0x2b   :  { %v2847_v20 = vld [vmem:[%s4814_s0 + $0x320] sm:$0xff]  ;;  %v2897_v40 = vld [vmem:[%s4814_s0 + $0x110] sm:$0xff] }
  0x2c   :  { %3160 = vrot.lane.b32.xlu1 %v3159_v60, %s3388_s12  ;;  %v3269_v60 = vpack.i.bf16 %v3765_v57, %v3760_v56  ;;  %v2865_v24 = vld [vmem:[%s4814_s0 + $0x460] sm:$0xff]  ;;  %v2913_v45 = vld [vmem:[%s4814_s0 + $0x230] sm:$0xff] }
  0x2d   :  { %3155 = vrot.lane.b32.xlu0 %v3154_v61, %s3388_s12  ;;  %v3264_v61 = vpack.i.bf16 %v3775_v59, %v3770_v58  ;;  %v2881_v34 = vld [vmem:[%s4814_s0 + $0x341] sm:$0xff]  ;;  %v2929_v50 = vld [vmem:[%s4814_s0 + $0x111] sm:$0xff] }
  0x2e   :  { %v3863_v39 = vld [vmem:[%s4814_s0 + $0x100] sm:$0xff]  ;;  %v3369_v53 = vpack.i.bf16 %v2929_v50, %v75_v11 }
  0x2f   :  { %v3871_v41 = vld [vmem:[%s4814_s0 + $0xe0] sm:$0xff] }
  0x30   :  { %3170 = vrot.lane.b32.xlu1 %v3169_v2, %s3389_s23  ;;  %v3289_v2 = vpack.i.bf16 %v3791_v1, %v2909_v62 }
  0x31   :  { %3165 = vrot.lane.b32.xlu0 %v3164_v3, %s3389_s23  ;;  %v3284_v3 = vpack.i.bf16 %v70_v28, %v69_v35  ;;  %v2878_v35 = vld [vmem:[%s4814_s0 + $0x311] sm:$0xff] }
  0x34   :  { %3180 = vrot.lane.b32.xlu1 %v3179_v8, %s3390_s9  ;;  %v3294_v8 = vpack.i.bf16 %v2925_v6, %v71_v29  ;;  %v2880_v29 = vld [vmem:[%s4814_s0 + $0x331] sm:$0xff] }
  0x35   :  { %3175 = vrot.lane.b32.xlu0 %v3174_v9, %s3390_s9  ;;  %v74_v9 = vld [vmem:[%s4814_s0 + $0xf1] sm:$0xff] }
  0x38   :  { %3190 = vrot.lane.b32.xlu1 %v3189_v14, %s3391_s13  ;;  %v73_v14 = vld [vmem:[%s4814_s0 + $0xe1] sm:$0xff] }
  0x39   :  { %3185 = vrot.lane.b32.xlu0 %v3184_v15, %s3391_s13  ;;  %v3309_v15 = vpack.i.bf16 %v75_v11, %v74_v9  ;;  %v3304_v16 = vpack.i.bf16 %v73_v14, %v2925_v6 }
  0x3c   :  { %3200 = vrot.lane.b32.xlu1 %v3199_v17, %s3392_s16  ;;  %v2848_v17 = vld [vmem:[%s4814_s0 + $0x330] sm:$0xff] }
  0x3d   :  { %3195 = vrot.lane.b32.xlu0 %v3194_v18, %s3392_s16  ;;  %v2849_v18 = vld [vmem:[%s4814_s0 + $0x340] sm:$0xff] }
  0x40   :  { %3210 = vrot.lane.b32.xlu1 %v3209_v21, %s3387_s18  ;;  %v3319_v21 = vpack.i.bf16 %v2849_v18, %v2848_v17 }
  0x41   :  { %3205 = vrot.lane.b32.xlu0 %v3204_v22, %s3393_s26  ;;  %v3314_v22 = vpack.i.bf16 %v2847_v20, %v2846_v19 }
  0x44   :  { %3220 = vrot.lane.b32.xlu1 %v3219_v26, %s3387_s18  ;;  %v2863_v26 = vld [vmem:[%s4814_s0 + $0x440] sm:$0xff] }
  0x45   :  { %3215 = vrot.lane.b32.xlu0 %v3214_v27, %s3393_s26  ;;  %v3329_v27 = vpack.i.bf16 %v2865_v24, %v2864_v23  ;;  %v3324_v28 = vpack.i.bf16 %v2863_v26, %v2862_v25 }
  0x48   :  { %3230 = vrot.lane.b32.xlu1 %v3229_v36, %s3386_s17  ;;  %v2879_v36 = vld [vmem:[%s4814_s0 + $0x321] sm:$0xff] }
  0x49   :  { %3225 = vrot.lane.b32.xlu0 %v3224_v37, %s3386_s17  ;;  %v3339_v37 = vpack.i.bf16 %v2881_v34, %v2880_v29  ;;  %v3334_v38 = vpack.i.bf16 %v2879_v36, %v2878_v35 }
  0x4c   :  { %3240 = vrot.lane.b32.xlu1 %v3239_v42, %s3388_s12  ;;  %v3876_v42 = vld [vmem:[%s4814_s0 + $0xf0] sm:$0xff] }
  0x4d   :  { %3235 = vrot.lane.b32.xlu0 %v3234_v43, %s3388_s12  ;;  %v3349_v43 = vpack.i.bf16 %v2897_v40, %v3863_v39  ;;  %v3344_v44 = vpack.i.bf16 %v3876_v42, %v3871_v41 }
  0x50   :  { %3250 = vrot.lane.b32.xlu1 %v3249_v48, %s3389_s23  ;;  %v3359_v48 = vpack.i.bf16 %v2913_v45, %v2833_v5 }
  0x51   :  { %3245 = vrot.lane.b32.xlu0 %v3244_v49, %s3389_s23  ;;  %v3354_v49 = vpack.i.bf16 %v2832_v4, %v3791_v1 }
  0x54   :  { %3260 = vrot.lane.b32.xlu1 %v3259_v54, %s3390_s9  ;;  %v3364_v54 = vpack.i.bf16 %v74_v9, %v73_v14 }
  0x55   :  { %3255 = vrot.lane.b32.xlu0 %v3254_v55, %s3390_s9 }
  0x58   :  { %3270 = vrot.lane.b32.xlu1 %v3269_v60, %s3391_s13 }
  0x59   :  { %3265 = vrot.lane.b32.xlu0 %v3264_v61, %s3391_s13 }
  0x5c   :  { %3280 = vrot.lane.b32.xlu1 %v3279_v63, %s3392_s16 }
  0x5d   :  { %3275 = vrot.lane.b32.xlu0 %v3274_v0, %s3392_s16 }
  0x60   :  { %3290 = vrot.lane.b32.xlu1 %v3289_v2, %s3387_s18  ;;  %v27_v2 = vld [vmem:[%s4814_s0] sm:$0xff] }
  0x61   :  { %3285 = vrot.lane.b32.xlu0 %v3284_v3, %s3393_s26 }
  0x64   :  { %3300 = vrot.lane.b32.xlu1 %v3299_v7, %s3387_s18 }
  0x65   :  { %3295 = vrot.lane.b32.xlu0 %v3294_v8, %s3393_s26 }
  0x68   :  { %3310 = vrot.lane.b32.xlu1 %v3309_v15, %s3386_s17 }
  0x69   :  { %3305 = vrot.lane.b32.xlu0 %v3304_v16, %s3386_s17 }
  0x6c   :  { %3320 = vrot.lane.b32.xlu1 %v3319_v21, %s3388_s12 }
  0x6d   :  { %3315 = vrot.lane.b32.xlu0 %v3314_v22, %s3388_s12 }
  0x70   :  { %3330 = vrot.lane.b32.xlu1 %v3329_v27, %s3389_s23 }
  0x71   :  { %3325 = vrot.lane.b32.xlu0 %v3324_v28, %s3389_s23 }
  0x74   :  { %3340 = vrot.lane.b32.xlu1 %v3339_v37, %s3390_s9 }
  0x75   :  { %3335 = vrot.lane.b32.xlu0 %v3334_v38, %s3390_s9 }
  0x76   :  { %v3066_v46 = vpop.permute.xlu1 %3065 }
  0x77   :  { %v3056_v47 = vpop.permute.xlu0 %3055  ;;  %v3068_v6 = vunpack.i.h.bf16 %v3066_v46  ;;  %v3067_v7 = vunpack.i.l.bf16 %v3066_v46 }
  0x78   :  { %3350 = vrot.lane.b32.xlu1 %v3349_v43, %s3391_s13  ;;  %v3058_v63 = vunpack.i.h.bf16 %v3056_v47  ;;  %v3057_v0 = vunpack.i.l.bf16 %v3056_v47 }
  0x79   :  { %3345 = vrot.lane.b32.xlu0 %v3344_v44, %s3391_s13 }
  0x7a   :  { %v3071_v51 = vpop.permute.xlu1 %3070  ;;  %v689_v8 = vsel %vm688_vm1, %v27_v2, %v3057_v0  ;;  %v690_v9 = vsel %vm688_vm1, %v3531_v32, %v3058_v63 }
  0x7b   :  { %v3061_v52 = vpop.permute.xlu0 %3060  ;;  %v3073_v11 = vunpack.i.h.bf16 %v3071_v51  ;;  %v3072_v14 = vunpack.i.l.bf16 %v3071_v51  ;;  %v706_v23 = vsel %vm705_vm2, %v689_v8, %v3067_v7  ;;  %v707_v32 = vsel %vm705_vm2, %v690_v9, %v3068_v6 }
  0x7c   :  { %3360 = vrot.lane.b32.xlu1 %v3359_v48, %s3392_s16  ;;  %v3063_v3 = vunpack.i.h.bf16 %v3061_v52  ;;  %v3062_v4 = vunpack.i.l.bf16 %v3061_v52 }
  0x7d   :  { %3355 = vrot.lane.b32.xlu0 %v3354_v49, %s3392_s16 }
  0x7e   :  { %v3081_v55 = vpop.permute.xlu1 %3080  ;;  %v691_v16 = vsel %vm688_vm1, %v3536_v33, %v3062_v4  ;;  %v692_v17 = vsel %vm688_vm1, %v3521_v30, %v3063_v3 }
  0x7f   :  { %v3076_v60 = vpop.permute.xlu0 %3075  ;;  %v3083_v18 = vunpack.i.h.bf16 %v3081_v55  ;;  %v3082_v19 = vunpack.i.l.bf16 %v3081_v55  ;;  %v708_v24 = vsel %vm705_vm2, %v691_v16, %v3072_v14  ;;  %v709_v33 = vsel %vm705_vm2, %v692_v17, %v3073_v11 }
  0x80   :  { %3370 = vrot.lane.b32.xlu1 %v3369_v53, %s3393_s26  ;;  %v3078_v21 = vunpack.i.h.bf16 %v3076_v60  ;;  %v3077_v22 = vunpack.i.l.bf16 %v3076_v60 }
  0x81   :  { %3365 = vrot.lane.b32.xlu0 %v3364_v54, %s3393_s26  ;;  %v725_v27 = vsel %vm722_vm3, %v708_v24, %v3082_v19  ;;  %v726_v28 = vsel %vm722_vm3, %v709_v33, %v3083_v18 }
  0x82   :  { %v3896_v61 = vpop.permute.xlu1 %3090  ;;  %v723_v36 = vsel %vm722_vm3, %v706_v23, %v3077_v22  ;;  %v724_v37 = vsel %vm722_vm3, %v707_v32, %v3078_v21 }
  0x83   :  { %v3086_v62 = vpop.permute.xlu0 %3085  ;;  %v3093_v43 = vunpack.i.h.bf16 %v3896_v61  ;;  %v3092_v44 = vunpack.i.l.bf16 %v3896_v61 }
  0x84   :  { %v3088_v25 = vunpack.i.h.bf16 %v3086_v62  ;;  %v3087_v26 = vunpack.i.l.bf16 %v3086_v62 }
  0x85   :  { %v743_v6 = vsel %vm739_vm4, %v726_v28, %v3093_v43 }
  0x86   :  { %v3898_v1 = vpop.permute.xlu1 %3100  ;;  %v740_v47 = vsel %vm739_vm4, %v723_v36, %v3087_v26  ;;  %v741_v48 = vsel %vm739_vm4, %v724_v37, %v3088_v25 }
  0x87   :  { %v3096_v5 = vpop.permute.xlu0 %3095  ;;  %v3103_v49 = vunpack.i.h.bf16 %v3898_v1  ;;  %v3102_v50 = vunpack.i.l.bf16 %v3898_v1 }
  0x88   :  { %v3098_v29 = vunpack.i.h.bf16 %v3096_v5  ;;  %v3097_v34 = vunpack.i.l.bf16 %v3096_v5  ;;  %v742_v5 = vsel %vm739_vm4, %v725_v27, %v3092_v44 }
  0x89   :  { %v759_v11 = vsel %vm756_vm5, %v742_v5, %v3102_v50  ;;  %v760_v14 = vsel %vm756_vm5, %v743_v6, %v3103_v49 }
  0x8a   :  { %v3906_v15 = vpop.permute.xlu1 %3110  ;;  %v757_v52 = vsel %vm756_vm5, %v740_v47, %v3097_v34  ;;  %v758_v53 = vsel %vm756_vm5, %v741_v48, %v3098_v29 }
  0x8b   :  { %v3106_v20 = vpop.permute.xlu0 %3105  ;;  %v3113_v54 = vunpack.i.h.bf16 %v3906_v15  ;;  %v3112_v55 = vunpack.i.l.bf16 %v3906_v15 }
  0x8c   :  { %v3108_v38 = vunpack.i.h.bf16 %v3106_v20  ;;  %v3107_v40 = vunpack.i.l.bf16 %v3106_v20 }
  0x8d   :  { %v776_v17 = vsel %vm773_vm6, %v759_v11, %v3112_v55  ;;  %v777_v18 = vsel %vm773_vm6, %v760_v14, %v3113_v54 }
  0x8e   :  { %v3121_v30 = vpop.permute.xlu1 %3120  ;;  %v774_v63 = vsel %vm773_vm6, %v757_v52, %v3107_v40  ;;  %v775_v0 = vsel %vm773_vm6, %v758_v53, %v3108_v38 }
  0x8f   :  { %v3116_v35 = vpop.permute.xlu0 %3115  ;;  %v3123_v2 = vunpack.i.h.bf16 %v3121_v30  ;;  %v3122_v3 = vunpack.i.l.bf16 %v3121_v30 }
  0x90   :  { %v3118_v45 = vunpack.i.h.bf16 %v3116_v35  ;;  %v3117_v46 = vunpack.i.l.bf16 %v3116_v35 }
  0x91   :  { %v793_v21 = vsel %vm790_vm7, %v776_v17, %v3122_v3  ;;  %v794_v22 = vsel %vm790_vm7, %v777_v18, %v3123_v2 }
  0x92   :  { %v3131_v51 = vpop.permute.xlu1 %3130  ;;  %v791_v1 = vsel %vm790_vm7, %v774_v63, %v3117_v46  ;;  %v792_v4 = vsel %vm790_vm7, %v775_v0, %v3118_v45 }
  0x93   :  { %v3126_v60 = vpop.permute.xlu0 %3125  ;;  %v3133_v37 = vunpack.i.h.bf16 %v3131_v51  ;;  %v3132_v38 = vunpack.i.l.bf16 %v3131_v51 }
  0x94   :  { %v3128_v61 = vunpack.i.h.bf16 %v3126_v60  ;;  %v3127_v62 = vunpack.i.l.bf16 %v3126_v60 }
  0x95   :  { %v693_v55 = vsel %vm688_vm1, %v3526_v31, %v3132_v38  ;;  %v694_v51 = vsel %vm688_vm1, %v3659_v12, %v3133_v37 }
  0x96   :  { %v3141_v7 = vpop.permute.xlu1 %3140  ;;  %v808_v8 = vsel %vm807_vm8, %v791_v1, %v3127_v62  ;;  %v809_v9 = vsel %vm807_vm8, %v792_v4, %v3128_v61 }
  0x97   :  { %v3136_v15 = vpop.permute.xlu0 %3135  ;;  %v824_v16 = vpack.c.bf16 %v809_v9, %v808_v8  ;;  %v3143_v35 = vunpack.i.h.bf16 %v3141_v7  ;;  %v3142_v36 = vunpack.i.l.bf16 %v3141_v7 }
  0x98   :  { %v3138_v19 = vunpack.i.h.bf16 %v3136_v15  ;;  %v3137_v20 = vunpack.i.l.bf16 %v3136_v15 }
  0x99   :  { %2982 = vmatprep.mubr.msk.bf16.mxu0 %vm852_vm9, %v824_v16  ;;  %v695_v50 = vsel %vm688_vm1, %v3664_v13, %v3142_v36  ;;  %v696_v52 = vsel %vm688_vm1, %v3651_v10, %v3143_v35 }
  0x9a   :  { %v810_v23 = vsel %vm807_vm8, %v793_v21, %v3137_v20  ;;  %v811_v32 = vsel %vm807_vm8, %v794_v22, %v3138_v19  ;;  %v3151_v24 = vpop.permute.xlu1 %3150 }
  0x9b   :  { %v3146_v33 = vpop.permute.xlu0 %3145  ;;  %v825_v25 = vpack.c.bf16 %v811_v32, %v810_v23  ;;  %v3153_v40 = vunpack.i.h.bf16 %v3151_v24  ;;  %v3152_v43 = vunpack.i.l.bf16 %v3151_v24 }
  0x9c   :  { %v3148_v44 = vunpack.i.h.bf16 %v3146_v33  ;;  %v3147_v45 = vunpack.i.l.bf16 %v3146_v33 }
  0x9d   :  { %2983 = vmatmul.mubr.msk.bf16.vlgmr.msra.gmra.mxu0 %vm852_vm9, %v825_v25  ;;  %v712_v60 = vsel %vm705_vm2, %v695_v50, %v3152_v43  ;;  %v713_v61 = vsel %vm705_vm2, %v696_v52, %v3153_v40 }
  0x9e   :  { %v3161_v26 = vpop.permute.xlu1 %3160  ;;  %v710_v62 = vsel %vm705_vm2, %v693_v55, %v3147_v45  ;;  %v711_v63 = vsel %vm705_vm2, %v694_v51, %v3148_v44 }
  0x9f   :  { %v3156_v30 = vpop.permute.xlu0 %3155  ;;  %v3163_v47 = vunpack.i.h.bf16 %v3161_v26  ;;  %v3162_v48 = vunpack.i.l.bf16 %v3161_v26 }
  0xa0   :  { %v3158_v53 = vunpack.i.h.bf16 %v3156_v30  ;;  %v3157_v54 = vunpack.i.l.bf16 %v3156_v30 }
  0xa1   :  { %v729_v10 = vsel %vm722_vm3, %v712_v60, %v3162_v48  ;;  %v730_v3 = vsel %vm722_vm3, %v713_v61, %v3163_v47 }
  0xa2   :  { %v3948_v27 = vpop.permute.xlu1 %3170  ;;  %v727_v12 = vsel %vm722_vm3, %v710_v62, %v3157_v54  ;;  %v728_v5 = vsel %vm722_vm3, %v711_v63, %v3158_v53 }
  0xa3   :  { %v3166_v28 = vpop.permute.xlu0 %3165  ;;  %v3173_v8 = vunpack.i.h.bf16 %v3948_v27  ;;  %v3172_v9 = vunpack.i.l.bf16 %v3948_v27 }
  0xa4   :  { %v3168_v13 = vunpack.i.h.bf16 %v3166_v28  ;;  %v3167_v0 = vunpack.i.l.bf16 %v3166_v28 }
  0xa5   :  { %v747_v35 = vsel %vm739_vm4, %v730_v3, %v3173_v8 }
  0xa6   :  { %v3950_v29 = vpop.permute.xlu1 %3180  ;;  %v744_v15 = vsel %vm739_vm4, %v727_v12, %v3167_v0  ;;  %v745_v16 = vsel %vm739_vm4, %v728_v5, %v3168_v13  ;;  %v35_v5 = vld [vmem:[%s4814_s0 + $0x90] sm:$0xff]  ;;  %s3395_s0 = smov 48  }
  0xa7   :  { %v3176_v34 = vpop.permute.xlu0 %3175  ;;  %v3183_v17 = vunpack.i.h.bf16 %v3950_v29  ;;  %v3182_v18 = vunpack.i.l.bf16 %v3950_v29 }
  0xa8   :  { %v3178_v1 = vunpack.i.h.bf16 %v3176_v34  ;;  %v3177_v31 = vunpack.i.l.bf16 %v3176_v34  ;;  %v746_v34 = vsel %vm739_vm4, %v729_v10, %v3172_v9 }
  0xa9   :  { %v763_v40 = vsel %vm756_vm5, %v746_v34, %v3182_v18  ;;  %v764_v43 = vsel %vm756_vm5, %v747_v35, %v3183_v17 }
  0xaa   :  { %v3191_v46 = vpop.permute.xlu1 %3190  ;;  %v761_v20 = vsel %vm756_vm5, %v744_v15, %v3177_v31  ;;  %v762_v21 = vsel %vm756_vm5, %v745_v16, %v3178_v1 }
  0xab   :  { %v3186_v49 = vpop.permute.xlu0 %3185  ;;  %v3193_v22 = vunpack.i.h.bf16 %v3191_v46  ;;  %v3192_v23 = vunpack.i.l.bf16 %v3191_v46 }
  0xac   :  { %v3188_v6 = vunpack.i.h.bf16 %v3186_v49  ;;  %v3187_v7 = vunpack.i.l.bf16 %v3186_v49 }
  0xad   :  { %v780_v46 = vsel %vm773_vm6, %v763_v40, %v3192_v23  ;;  %v781_v47 = vsel %vm773_vm6, %v764_v43, %v3193_v22 }
  0xae   :  { %v3201_v2 = vpop.permute.xlu1 %3200  ;;  %v778_v24 = vsel %vm773_vm6, %v761_v20, %v3187_v7  ;;  %v779_v33 = vsel %vm773_vm6, %v762_v21, %v3188_v6 }
  0xaf   :  { %v3196_v4 = vpop.permute.xlu0 %3195  ;;  %v3203_v30 = vunpack.i.h.bf16 %v3201_v2  ;;  %v3202_v27 = vunpack.i.l.bf16 %v3201_v2 }
  0xb0   :  { %v3198_v11 = vunpack.i.h.bf16 %v3196_v4  ;;  %v3197_v14 = vunpack.i.l.bf16 %v3196_v4 }
  0xb1   :  { %v797_v50 = vsel %vm790_vm7, %v780_v46, %v3202_v27  ;;  %v798_v52 = vsel %vm790_vm7, %v781_v47, %v3203_v30 }
  0xb2   :  { %v3211_v19 = vpop.permute.xlu1 %3210  ;;  %v795_v28 = vsel %vm790_vm7, %v778_v24, %v3197_v14  ;;  %v796_v29 = vsel %vm790_vm7, %v779_v33, %v3198_v11 }
  0xb3   :  { %v3206_v32 = vpop.permute.xlu0 %3205  ;;  %v3213_v1 = vunpack.i.h.bf16 %v3211_v19  ;;  %v3212_v31 = vunpack.i.l.bf16 %v3211_v19 }
  0xb4   :  { %v3208_v25 = vunpack.i.h.bf16 %v3206_v32  ;;  %v3207_v26 = vunpack.i.l.bf16 %v3206_v32 }
  0xb5   :  { %v697_v19 = vsel %vm688_vm1, %v35_v5, %v3212_v31  ;;  %v698_v20 = vsel %vm688_vm1, %v3770_v58, %v3213_v1 }
  0xb6   :  { %v812_v36 = vsel %vm807_vm8, %v795_v28, %v3207_v26  ;;  %v813_v37 = vsel %vm807_vm8, %v796_v29, %v3208_v25  ;;  %v3221_v38 = vpop.permute.xlu1 %3220 }
  0xb7   :  { %v3216_v44 = vpop.permute.xlu0 %3215  ;;  %v826_v45 = vpack.c.bf16 %v813_v37, %v812_v36  ;;  %v3223_v10 = vunpack.i.h.bf16 %v3221_v38  ;;  %v3222_v3 = vunpack.i.l.bf16 %v3221_v38 }
  0xb8   :  { %v3218_v48 = vunpack.i.h.bf16 %v3216_v44  ;;  %v3217_v49 = vunpack.i.l.bf16 %v3216_v44 }
  0xb9   :  { %2986 = vmatprep.mubr.msk.bf16.mxu0 %vm852_vm9, %v826_v45  ;;  %v699_v15 = vsel %vm688_vm1, %v3775_v59, %v3222_v3  ;;  %v700_v16 = vsel %vm688_vm1, %v3760_v56, %v3223_v10 }
  0xba   :  { %v814_v53 = vsel %vm807_vm8, %v797_v50, %v3217_v49  ;;  %v815_v54 = vsel %vm807_vm8, %v798_v52, %v3218_v48  ;;  %v3231_v55 = vpop.permute.xlu1 %3230 }
  0xbb   :  { %v3226_v51 = vpop.permute.xlu0 %3225  ;;  %v827_v60 = vpack.c.bf16 %v815_v54, %v814_v53  ;;  %v3233_v4 = vunpack.i.h.bf16 %v3231_v55  ;;  %v3232_v12 = vunpack.i.l.bf16 %v3231_v55 }
  0xbc   :  { %v3228_v6 = vunpack.i.h.bf16 %v3226_v51  ;;  %v3227_v7 = vunpack.i.l.bf16 %v3226_v51 }
  0xbd   :  { %2987 = vmatmul.mubr.msk.bf16.gmra.mxu0 %vm852_vm9, %v827_v60  ;;  %v716_v21 = vsel %vm705_vm2, %v699_v15, %v3232_v12  ;;  %v717_v22 = vsel %vm705_vm2, %v700_v16, %v3233_v4 }
  0xbe   :  { %v3241_v61 = vpop.permute.xlu1 %3240  ;;  %v714_v23 = vsel %vm705_vm2, %v697_v19, %v3227_v7  ;;  %v715_v32 = vsel %vm705_vm2, %v698_v20, %v3228_v6 }
  0xbf   :  { %v3236_v62 = vpop.permute.xlu0 %3235  ;;  %v3243_v9 = vunpack.i.h.bf16 %v3241_v61  ;;  %v3242_v11 = vunpack.i.l.bf16 %v3241_v61 }
  0xc0   :  { %v3238_v17 = vunpack.i.h.bf16 %v3236_v62  ;;  %v3237_v18 = vunpack.i.l.bf16 %v3236_v62 }
  0xc1   :  { %v733_v56 = vsel %vm722_vm3, %v716_v21, %v3242_v11  ;;  %v734_v25 = vsel %vm722_vm3, %v717_v22, %v3243_v9 }
  0xc2   :  { %v3994_v63 = vpop.permute.xlu1 %3250  ;;  %v731_v58 = vsel %vm722_vm3, %v714_v23, %v3237_v18  ;;  %v732_v28 = vsel %vm722_vm3, %v715_v32, %v3238_v17 }
  0xc3   :  { %v3246_v13 = vpop.permute.xlu0 %3245  ;;  %v3253_v35 = vunpack.i.h.bf16 %v3994_v63  ;;  %v3252_v36 = vunpack.i.l.bf16 %v3994_v63 }
  0xc4   :  { %v3248_v24 = vunpack.i.h.bf16 %v3246_v13  ;;  %v3247_v59 = vunpack.i.l.bf16 %v3246_v13 }
  0xc5   :  { %v750_v13 = vsel %vm739_vm4, %v733_v56, %v3252_v36 }
  0xc6   :  { %v3996_v0 = vpop.permute.xlu1 %3260  ;;  %v748_v40 = vsel %vm739_vm4, %v731_v58, %v3247_v59  ;;  %v749_v43 = vsel %vm739_vm4, %v732_v28, %v3248_v24 }
  0xc7   :  { %v3256_v2 = vpop.permute.xlu0 %3255  ;;  %v3263_v44 = vunpack.i.h.bf16 %v3996_v0  ;;  %v3262_v45 = vunpack.i.l.bf16 %v3996_v0  ;;  %v751_v0 = vsel %vm739_vm4, %v734_v25, %v3253_v35 }
  0xc8   :  { %v3258_v26 = vunpack.i.h.bf16 %v3256_v2  ;;  %v3257_v30 = vunpack.i.l.bf16 %v3256_v2 }
  0xc9   :  { %v767_v1 = vsel %vm756_vm5, %v750_v13, %v3262_v45  ;;  %v768_v31 = vsel %vm756_vm5, %v751_v0, %v3263_v44 }
  0xca   :  { %v3271_v8 = vpop.permute.xlu1 %3270  ;;  %v765_v47 = vsel %vm756_vm5, %v748_v40, %v3257_v30  ;;  %v766_v48 = vsel %vm756_vm5, %v749_v43, %v3258_v26 }
  0xcb   :  { %v3266_v14 = vpop.permute.xlu0 %3265  ;;  %v3273_v49 = vunpack.i.h.bf16 %v3271_v8  ;;  %v3272_v50 = vunpack.i.l.bf16 %v3271_v8 }
  0xcc   :  { %v3268_v29 = vunpack.i.h.bf16 %v3266_v14  ;;  %v3267_v34 = vunpack.i.l.bf16 %v3266_v14 }
  0xcd   :  { %v784_v5 = vsel %vm773_vm6, %v767_v1, %v3272_v50  ;;  %v785_v6 = vsel %vm773_vm6, %v768_v31, %v3273_v49 }
  0xce   :  { %v3281_v33 = vpop.permute.xlu1 %3280  ;;  %v782_v53 = vsel %vm773_vm6, %v765_v47, %v3267_v34  ;;  %v783_v54 = vsel %vm773_vm6, %v766_v48, %v3268_v29 }
  0xcf   :  { %v3276_v27 = vpop.permute.xlu0 %3275  ;;  %v3283_v60 = vunpack.i.h.bf16 %v3281_v33  ;;  %v3282_v61 = vunpack.i.l.bf16 %v3281_v33 }
  0xd0   :  { %v3278_v37 = vunpack.i.h.bf16 %v3276_v27  ;;  %v3277_v38 = vunpack.i.l.bf16 %v3276_v27 }
  0xd1   :  { %v801_v9 = vsel %vm790_vm7, %v784_v5, %v3282_v61  ;;  %v802_v11 = vsel %vm790_vm7, %v785_v6, %v3283_v60 }
  0xd2   :  { %v3291_v46 = vpop.permute.xlu1 %3290  ;;  %v799_v62 = vsel %vm790_vm7, %v782_v53, %v3277_v38  ;;  %v800_v63 = vsel %vm790_vm7, %v783_v54, %v3278_v37 }
  0xd3   :  { %v3286_v52 = vpop.permute.xlu0 %3285  ;;  %v3293_v24 = vunpack.i.h.bf16 %v3291_v46  ;;  %v3292_v59 = vunpack.i.l.bf16 %v3291_v46 }
  0xd4   :  { %v3288_v55 = vunpack.i.h.bf16 %v3286_v52  ;;  %v3287_v51 = vunpack.i.l.bf16 %v3286_v52 }
  0xd5   :  { %v701_v37 = vsel %vm688_vm1, %v3765_v57, %v3292_v59  ;;  %v702_v38 = vsel %vm688_vm1, %v3871_v41, %v3293_v24 }
  0xd6   :  { %v816_v2 = vsel %vm807_vm8, %v799_v62, %v3287_v51  ;;  %v817_v10 = vsel %vm807_vm8, %v800_v63, %v3288_v55  ;;  %v3301_v3 = vpop.permute.xlu1 %3300 }
  0xd7   :  { %v3296_v4 = vpop.permute.xlu0 %3295  ;;  %v828_v12 = vpack.c.bf16 %v817_v10, %v816_v2  ;;  %v3303_v23 = vunpack.i.h.bf16 %v3301_v3  ;;  %v3302_v32 = vunpack.i.l.bf16 %v3301_v3 }
  0xd8   :  { %v3298_v7 = vunpack.i.h.bf16 %v3296_v4  ;;  %v3297_v8 = vunpack.i.l.bf16 %v3296_v4 }
  0xd9   :  { %2990 = vmatprep.mubr.msk.bf16.mxu0 %vm852_vm9, %v828_v12  ;;  %v703_v29 = vsel %vm688_vm1, %v3876_v42, %v3302_v32  ;;  %v704_v34 = vsel %vm688_vm1, %v3863_v39, %v3303_v23  ;;  %vm2225_vm1 = vcmask 588800  }
  0xda   :  { %v818_v14 = vsel %vm807_vm8, %v801_v9, %v3297_v8  ;;  %v819_v15 = vsel %vm807_vm8, %v802_v11, %v3298_v7  ;;  %v3311_v16 = vpop.permute.xlu1 %3310 }
  0xdb   :  { %v3306_v17 = vpop.permute.xlu0 %3305  ;;  %v829_v18 = vpack.c.bf16 %v819_v15, %v818_v14  ;;  %v3313_v33 = vunpack.i.h.bf16 %v3311_v16  ;;  %v3312_v56 = vunpack.i.l.bf16 %v3311_v16 }
  0xdc   :  { %v3308_v26 = vunpack.i.h.bf16 %v3306_v17  ;;  %v3307_v30 = vunpack.i.l.bf16 %v3306_v17 }
  0xdd   :  { %2991 = vmatmul.mubr.msk.bf16.gmra.mxu0 %vm852_vm9, %v829_v18  ;;  %v720_v40 = vsel %vm705_vm2, %v703_v29, %v3312_v56  ;;  %v721_v43 = vsel %vm705_vm2, %v704_v34, %v3313_v33  ;;  %v3394_v34 = vmov 0.0  }
  0xde   :  { %v3321_v19 = vpop.permute.xlu1 %3320  ;;  %v718_v45 = vsel %vm705_vm2, %v701_v37, %v3307_v30  ;;  %v719_v42 = vsel %vm705_vm2, %v702_v38, %v3308_v26  ;;  %1191 = vst.msk [vmem:[#allocation2 + $0xc0] sm:$0xff] %vm705_vm2, %v3394_v34  ;;  %1193 = vst.msk [vmem:[#allocation2 + $0xd0] sm:$0xff] %vm705_vm2, %v3394_v34  ;;  %3028 = vmatprep.subr.bf16.mxu1 %v3394_v34  ;;  %2998 = vmatprep.subr.bf16.mxu0 %v3394_v34 }
  0xdf   :  { %v3316_v20 = vpop.permute.xlu0 %3315  ;;  %v3323_v58 = vunpack.i.h.bf16 %v3321_v19  ;;  %v3322_v28 = vunpack.i.l.bf16 %v3321_v19  ;;  %1195 = vst.msk [vmem:[#allocation2 + $0xe0] sm:$0xff] %vm705_vm2, %v3394_v34  ;;  %1197 = vst.msk [vmem:[#allocation2 + $0xf0] sm:$0xff] %vm705_vm2, %v3394_v34  ;;  %3012 = vmatprep.mubr.msk.bf16.mxu1 %vm3399_vm12, %v3394_v34 }
  0xe0   :  { %v3318_v35 = vunpack.i.h.bf16 %v3316_v20  ;;  %v3317_v36 = vunpack.i.l.bf16 %v3316_v20  ;;  %1199 = vst.msk [vmem:[#allocation2 + $0x100] sm:$0xff] %vm705_vm2, %v3394_v34  ;;  %1201 = vst.msk [vmem:[#allocation2 + $0x110] sm:$0xff] %vm705_vm2, %v3394_v34 }
  0xe1   :  { %v737_v48 = vsel %vm722_vm3, %v720_v40, %v3322_v28  ;;  %v738_v49 = vsel %vm722_vm3, %v721_v43, %v3323_v58  ;;  %1203 = vst.msk [vmem:[#allocation2 + $0x120] sm:$0xff] %vm705_vm2, %v3394_v34  ;;  %1166 = vst.msk [vmem:[#allocation2] sm:$0xff] %vm705_vm2, %v3394_v34 }
  0xe2   :  { %v3331_v21 = vpop.permute.xlu1 %3330  ;;  %v735_v41 = vsel %vm722_vm3, %v718_v45, %v3317_v36  ;;  %v736_v52 = vsel %vm722_vm3, %v719_v42, %v3318_v35  ;;  %1169 = vst.msk [vmem:[#allocation2 + $0x10] sm:$0xff] %vm705_vm2, %v3394_v34  ;;  %1171 = vst.msk [vmem:[#allocation2 + $0x20] sm:$0xff] %vm705_vm2, %v3394_v34 }
  0xe3   :  { %v3326_v22 = vpop.permute.xlu0 %3325  ;;  %v3333_v46 = vunpack.i.h.bf16 %v3331_v21  ;;  %v3332_v47 = vunpack.i.l.bf16 %v3331_v21  ;;  %1173 = vst.msk [vmem:[#allocation2 + $0x30] sm:$0xff] %vm705_vm2, %v3394_v34  ;;  %1175 = vst.msk [vmem:[#allocation2 + $0x40] sm:$0xff] %vm705_vm2, %v3394_v34 }
  0xe4   :  { %v3328_v57 = vunpack.i.h.bf16 %v3326_v22  ;;  %v3327_v50 = vunpack.i.l.bf16 %v3326_v22  ;;  %1177 = vst.msk [vmem:[#allocation2 + $0x50] sm:$0xff] %vm705_vm2, %v3394_v34  ;;  %1179 = vst.msk [vmem:[#allocation2 + $0x60] sm:$0xff] %vm705_vm2, %v3394_v34 }
  0xe5   :  { %v754_v63 = vsel %vm739_vm4, %v737_v48, %v3332_v47  ;;  %v755_v13 = vsel %vm739_vm4, %v738_v49, %v3333_v46  ;;  %1181 = vst.msk [vmem:[#allocation2 + $0x70] sm:$0xff] %vm705_vm2, %v3394_v34  ;;  %1183 = vst.msk [vmem:[#allocation2 + $0x80] sm:$0xff] %vm705_vm2, %v3394_v34 }
  0xe6   :  { %v3341_v25 = vpop.permute.xlu1 %3340  ;;  %v752_v3 = vsel %vm739_vm4, %v735_v41, %v3327_v50  ;;  %v753_v1 = vsel %vm739_vm4, %v736_v52, %v3328_v57  ;;  %1185 = vst.msk [vmem:[#allocation2 + $0x90] sm:$0xff] %vm705_vm2, %v3394_v34  ;;  %1187 = vst.msk [vmem:[#allocation2 + $0xa0] sm:$0xff] %vm705_vm2, %v3394_v34 }
  0xe7   :  { %v3336_v27 = vpop.permute.xlu0 %3335  ;;  %v3343_v53 = vunpack.i.h.bf16 %v3341_v25  ;;  %v3342_v54 = vunpack.i.l.bf16 %v3341_v25  ;;  %1189 = vst.msk [vmem:[#allocation2 + $0xb0] sm:$0xff] %vm705_vm2, %v3394_v34  ;;  %1205 = vst.msk [vmem:[#allocation2 + $0x130] sm:$0xff] %vm705_vm2, %v3394_v34 }
  0xe8   :  { %v3338_v55 = vunpack.i.h.bf16 %v3336_v27  ;;  %v3337_v51 = vunpack.i.l.bf16 %v3336_v27  ;;  %1192 = vst.msk [vmem:[#allocation2 + $0xc8] sm:$0x3] %vm1167_vm10, %v3394_v34  ;;  %1194 = vst.msk [vmem:[#allocation2 + $0xd8] sm:$0x3] %vm1167_vm10, %v3394_v34  ;;  %v1236_v38 = vld [vmem:[#allocation2 + $0x2] sm:$0x3f] }
  0xe9   :  { %v771_v12 = vsel %vm756_vm5, %v754_v63, %v3342_v54  ;;  %v772_v5 = vsel %vm756_vm5, %v755_v13, %v3343_v53  ;;  %1196 = vst.msk [vmem:[#allocation2 + $0xe8] sm:$0x3] %vm1167_vm10, %v3394_v34  ;;  %1198 = vst.msk [vmem:[#allocation2 + $0xf8] sm:$0x3] %vm1167_vm10, %v3394_v34  ;;  %1346 = vrot.lane.b32.xlu0 %v1236_v38, %s3386_s17 }
  0xea   :  { %v3351_v44 = vpop.permute.xlu1 %3350  ;;  %v769_v8 = vsel %vm756_vm5, %v752_v3, %v3337_v51  ;;  %v770_v9 = vsel %vm756_vm5, %v753_v1, %v3338_v55  ;;  %1200 = vst.msk [vmem:[#allocation2 + $0x108] sm:$0x3] %vm1167_vm10, %v3394_v34  ;;  %1202 = vst.msk [vmem:[#allocation2 + $0x118] sm:$0x3] %vm1167_vm10, %v3394_v34 }
  0xeb   :  { %v3346_v39 = vpop.permute.xlu0 %3345  ;;  %v3353_v60 = vunpack.i.h.bf16 %v3351_v44  ;;  %v3352_v61 = vunpack.i.l.bf16 %v3351_v44  ;;  %1204 = vst.msk [vmem:[#allocation2 + $0x128] sm:$0x3] %vm1167_vm10, %v3394_v34  ;;  %1168 = vst.msk [vmem:[#allocation2 + $0x8] sm:$0x3] %vm1167_vm10, %v3394_v34 }
  0xec   :  { %v3348_v0 = vunpack.i.h.bf16 %v3346_v39  ;;  %v3347_v2 = vunpack.i.l.bf16 %v3346_v39  ;;  %1170 = vst.msk [vmem:[#allocation2 + $0x18] sm:$0x3] %vm1167_vm10, %v3394_v34  ;;  %1172 = vst.msk [vmem:[#allocation2 + $0x28] sm:$0x3] %vm1167_vm10, %v3394_v34 }
  0xed   :  { %v788_v11 = vsel %vm773_vm6, %v771_v12, %v3352_v61  ;;  %v789_v14 = vsel %vm773_vm6, %v772_v5, %v3353_v60  ;;  %1174 = vst.msk [vmem:[#allocation2 + $0x38] sm:$0x3] %vm1167_vm10, %v3394_v34  ;;  %1176 = vst.msk [vmem:[#allocation2 + $0x48] sm:$0x3] %vm1167_vm10, %v3394_v34  ;;  %v1303_v48 = vld [vmem:[#allocation2 + $0x90] sm:$0x3f] }
  0xee   :  { %v3361_v62 = vpop.permute.xlu1 %3360  ;;  %v786_v16 = vsel %vm773_vm6, %v769_v8, %v3347_v2  ;;  %v787_v17 = vsel %vm773_vm6, %v770_v9, %v3348_v0  ;;  %1178 = vst.msk [vmem:[#allocation2 + $0x58] sm:$0x3] %vm1167_vm10, %v3394_v34  ;;  %1180 = vst.msk [vmem:[#allocation2 + $0x68] sm:$0x3] %vm1167_vm10, %v3394_v34  ;;  %v1242_v52 = vld [vmem:[#allocation2 + $0xa2] sm:$0x3f] }
  0xef   :  { %v3356_v10 = vpop.permute.xlu0 %3355  ;;  %v3363_v31 = vunpack.i.h.bf16 %v3361_v62  ;;  %v3362_v4 = vunpack.i.l.bf16 %v3361_v62  ;;  %1182 = vst.msk [vmem:[#allocation2 + $0x78] sm:$0x3] %vm1167_vm10, %v3394_v34  ;;  %1184 = vst.msk [vmem:[#allocation2 + $0x88] sm:$0x3] %vm1167_vm10, %v3394_v34  ;;  %v1315_v63 = vld [vmem:[#allocation2 + $0x92] sm:$0x3f] }
  0xf0   :  { %v3358_v6 = vunpack.i.h.bf16 %v3356_v10  ;;  %v3357_v7 = vunpack.i.l.bf16 %v3356_v10  ;;  %1186 = vst.msk [vmem:[#allocation2 + $0x98] sm:$0x3] %vm1167_vm10, %v3394_v34  ;;  %1188 = vst.msk [vmem:[#allocation2 + $0xa8] sm:$0x3] %vm1167_vm10, %v3394_v34  ;;  %v1309_v0 = vld [vmem:[#allocation2 + $0x130] sm:$0x3f] }
  0xf1   :  { %v805_v21 = vsel %vm790_vm7, %v788_v11, %v3362_v4  ;;  %v806_v22 = vsel %vm790_vm7, %v789_v14, %v3363_v31  ;;  %1190 = vst.msk [vmem:[#allocation2 + $0xb8] sm:$0x3] %vm1167_vm10, %v3394_v34  ;;  %1206 = vst.msk [vmem:[#allocation2 + $0x138] sm:$0x3] %vm1167_vm10, %v3394_v34 }
  0xf2   :  { %v3371_v15 = vpop.permute.xlu1 %3370  ;;  %v803_v24 = vsel %vm790_vm7, %v786_v16, %v3357_v7  ;;  %v804_v59 = vsel %vm790_vm7, %v787_v17, %v3358_v6  ;;  %v1248_v42 = vld [vmem:[#allocation2 + $0x4] sm:$0x3f] }
  0xf3   :  { %v3373_v18 = vunpack.i.h.bf16 %v3371_v15  ;;  %v3372_v19 = vunpack.i.l.bf16 %v3371_v15  ;;  %v3366_v20 = vpop.permute.xlu0 %3365  ;;  %1394 = vrot.lane.b32.xlu0 %v1248_v42, %s3389_s23 }
  0xf4   :  { %v3368_v23 = vunpack.i.h.bf16 %v3366_v20  ;;  %v3367_v32 = vunpack.i.l.bf16 %v3366_v20 }
  0xf5   :  { %v822_v33 = vsel %vm807_vm8, %v805_v21, %v3372_v19  ;;  %v823_v56 = vsel %vm807_vm8, %v806_v22, %v3373_v18 }
  0xf6   :  { %v831_v25 = vpack.c.bf16 %v823_v56, %v822_v33  ;;  %v820_v26 = vsel %vm807_vm8, %v803_v24, %v3367_v32  ;;  %v821_v30 = vsel %vm807_vm8, %v804_v59, %v3368_v23 }
  0xf7   :  { %v830_v27 = vpack.c.bf16 %v821_v30, %v820_v26  ;;  %1596 = vrot.lane.b32.xlu0 %v1303_v48, %s3395_s0  ;;  %v1254_v54 = vld [vmem:[#allocation2 + $0xa4] sm:$0x3f]  ;;  %v1327_v61 = vld [vmem:[#allocation2 + $0x94] sm:$0x3f] }
  0xf8   :  { %1406 = vrot.lane.b32.xlu1 %v1254_v54, %s3389_s23 }
  0xf9   :  { %2994 = vmatprep.mubr.msk.bf16.mxu0 %vm852_vm9, %v830_v27 }
  0xfa   :  { %2995 = vmatmul.mubr.msk.bf16.gmra.mxu0 %vm852_vm9, %v831_v25 }
  0xfb   :  { %1358 = vrot.lane.b32.xlu0 %v1242_v52, %s3386_s17  ;;  %3008 = vmatprep.mubr.msk.bf16.mxu0 %vm3399_vm12, %v3394_v34 }
  0xfc   :  { %1692 = vrot.lane.b32.xlu1 %v1327_v61, %s3396_s8 }
  0xff   :  { %1644 = vrot.lane.b32.xlu0 %v1315_v63, %s3397_s10 }
 0x100   :  { %1608 = vrot.lane.b32.xlu1 %v1309_v0, %s3395_s0 }
 0x15d   :  { %v4080_v58 = vpop.f32.mrf.mxu0 }
 0x15e   :  { %v981_v46 = vsel %vm705_vm2, %v4080_v58, 0.0 }
 0x15f   :  { %v4082_v28 = vpop.f32.mrf.mxu0 }
 0x160   :  { %v978_v43 = vsel %vm705_vm2, %v4082_v28, 0.0 }
 0x161   :  { %v4084_v29 = vpop.f32.mrf.mxu0 }
 0x162   :  { %v983_v57 = vsel %vm705_vm2, %v4084_v29, 0.0 }
 0x163   :  { %v4128_v35 = vpop.f32.mrf.mxu0 }
 0x164   :  { %v979_v40 = vsel %vm705_vm2, %v4128_v35, 0.0 }
 0x165   :  { %v980_v44 = vadd.f32 %v979_v40, %v978_v43 }
 0x167   :  { %v982_v47 = vadd.f32 %v981_v46, %v980_v44 }
 0x169   :  { %v984_v41 = vadd.f32 %v983_v57, %v982_v47 }
 0x17d   :  { %v4130_v36 = vpop.f32.mrf.mxu0 }
 0x17e   :  { %v989_v13 = vsel %vm705_vm2, %v4130_v36, 0.0 }
 0x17f   :  { %v4172_v37 = vpop.f32.mrf.mxu0 }
 0x180   :  { %v985_v50 = vsel %vm705_vm2, %v4172_v37, 0.0 }
 0x181   :  { %v4179_v45 = vpop.f32.mrf.mxu0  ;;  %v986_v55 = vadd.f32 %v985_v50, %v984_v41 }
 0x182   :  { %v991_v3 = vsel %vm705_vm2, %v4179_v45, 0.0 }
 0x183   :  { %v4184_v39 = vpop.f32.mrf.mxu0 }
 0x184   :  { %v987_v53 = vsel %vm705_vm2, %v4184_v39, 0.0 }
 0x185   :  { %v988_v60 = vadd.f32 %v987_v53, %v986_v55 }
 0x187   :  { %v990_v2 = vadd.f32 %v989_v13, %v988_v60 }
 0x189   :  { %v992_v31 = vadd.f32 %v991_v3, %v990_v2 }
 0x19d   :  { %v4187_v49 = vpop.f32.mrf.mxu0 }
 0x19e   :  { %v997_v6 = vsel %vm705_vm2, %v4187_v49, 0.0 }
 0x19f   :  { %v4196_v51 = vpop.f32.mrf.mxu0 }
 0x1a0   :  { %v993_v1 = vsel %vm705_vm2, %v4196_v51, 0.0 }
 0x1a1   :  { %v4199_v62 = vpop.f32.mrf.mxu0  ;;  %v994_v12 = vadd.f32 %v993_v1, %v992_v31 }
 0x1a2   :  { %v999_v11 = vsel %vm705_vm2, %v4199_v62, 0.0 }
 0x1a3   :  { %v950_v10 = vpop.f32.mrf.mxu0 }
 0x1a4   :  { %v995_v4 = vsel %vm705_vm2, %v950_v10, 0.0 }
 0x1a5   :  { %v996_v5 = vadd.f32 %v995_v4, %v994_v12 }
 0x1a7   :  { %v998_v7 = vadd.f32 %v997_v6, %v996_v5 }
 0x1a9   :  { %v1000_v15 = vadd.f32 %v999_v11, %v998_v7 }
 0x1ba   :  { %v4213_v8 = vpop.f32.mrf.mxu0 }
 0x1bb   :  { %v1005_v21 = vsel %vm705_vm2, %v4213_v8, 0.0 }
 0x1bc   :  { %v963_v9 = vpop.f32.mrf.mxu0 }
 0x1bd   :  { %v1001_v14 = vsel %vm705_vm2, %v963_v9, 0.0 }
 0x1be   :  { %v4218_v16 = vpop.f32.mrf.mxu0  ;;  %v1002_v17 = vadd.f32 %v1001_v14, %v1000_v15 }
 0x1bf   :  { %v1007_v23 = vsel %vm705_vm2, %v4218_v16, 0.0 }
 0x1c0   :  { %v966_v18 = vpop.f32.mrf.mxu0 }
 0x1c1   :  { %v1003_v19 = vsel %vm705_vm2, %v966_v18, 0.0 }
 0x1c2   :  { %v1004_v20 = vadd.f32 %v1003_v19, %v1002_v17 }
 0x1c4   :  { %v1006_v22 = vadd.f32 %v1005_v21, %v1004_v20 }
 0x1c6   :  { %v1008_v32 = vadd.f32 %v1007_v23, %v1006_v22 }
 0x1c8   :  { %v1009_v24 = vrot.slane %v1008_v32, 4 }
 0x1ca   :  { %v1010_v59 = vadd.f32 %v1009_v24, %v1008_v32 }
 0x1cc   :  { %v1011_v33 = vrot.slane %v1010_v59, 2 }
 0x1ce   :  { %v1012_v56 = vadd.f32 %v1011_v33, %v1010_v59 }
 0x1d0   :  { %v1013_v25 = vrot.slane %v1012_v56, 1 }
 0x1d2   :  { %v1014_v26 = vadd.f32 %v1013_v25, %v1012_v56 }
 0x1d4   :  { %v1015_v30 = vmul.f32 0.0078125, %v1014_v26 }
 0x1d6   :  { %v4226_v27 = vsub.f32 %v4082_v28, %v1015_v30  ;;  %v4229_v38 = vsub.f32 %v4128_v35, %v1015_v30  ;;  %v4232_v40 = vsub.f32 %v4080_v58, %v1015_v30  ;;  %v4235_v43 = vsub.f32 %v4084_v29, %v1015_v30 }
 0x1d7   :  { %v4242_v46 = vsub.f32 %v4172_v37, %v1015_v30  ;;  %v4247_v35 = vsub.f32 %v4184_v39, %v1015_v30  ;;  %v4254_v57 = vsub.f32 %v4130_v36, %v1015_v30  ;;  %v4260_v39 = vsub.f32 %v4179_v45, %v1015_v30 }
 0x1d8   :  { %v1032_v44 = vmul.f32 %v4226_v27, %v4226_v27  ;;  %v1033_v42 = vmul.f32 %v4229_v38, %v4229_v38  ;;  %v1034_v28 = vmul.f32 %v4232_v40, %v4232_v40  ;;  %v1035_v58 = vmul.f32 %v4235_v43, %v4235_v43 }
 0x1d9   :  { %v1036_v37 = vmul.f32 %v4242_v46, %v4242_v46  ;;  %v1037_v52 = vmul.f32 %v4247_v35, %v4247_v35  ;;  %v4266_v55 = vsub.f32 %v4196_v51, %v1015_v30  ;;  %v1038_v36 = vmul.f32 %v4254_v57, %v4254_v57 }
 0x1da   :  { %v1048_v29 = vsel %vm705_vm2, %v1032_v44, 0.0  ;;  %v1049_v47 = vsel %vm705_vm2, %v1033_v42, 0.0  ;;  %v1051_v50 = vsel %vm705_vm2, %v1034_v28, 0.0  ;;  %v1053_v53 = vsel %vm705_vm2, %v1035_v58, 0.0 }
 0x1db   :  { %v1050_v48 = vadd.f32 %v1049_v47, %v1048_v29  ;;  %v1055_v60 = vsel %vm705_vm2, %v1036_v37, 0.0  ;;  %v4271_v63 = vsub.f32 %v950_v10, %v1015_v30  ;;  %v1039_v45 = vmul.f32 %v4260_v39, %v4260_v39 }
 0x1dc   :  { %v1057_v13 = vsel %vm705_vm2, %v1037_v52, 0.0  ;;  %v4277_v2 = vsub.f32 %v4187_v49, %v1015_v30  ;;  %v1040_v51 = vmul.f32 %v4266_v55, %v4266_v55  ;;  %v1059_v3 = vsel %vm705_vm2, %v1038_v36, 0.0 }
 0x1dd   :  { %v1052_v41 = vadd.f32 %v1051_v50, %v1050_v48  ;;  %v4283_v31 = vsub.f32 %v4199_v62, %v1015_v30  ;;  %v1041_v10 = vmul.f32 %v4271_v63, %v4271_v63  ;;  %v1061_v4 = vsel %vm705_vm2, %v1039_v45, 0.0  ;;  %v1224_v50 = vld [vmem:[#allocation2] sm:$0x3f] }
 0x1de   :  { %v1028_v5 = vsub.f32 %v963_v9, %v1015_v30  ;;  %v1042_v49 = vmul.f32 %v4277_v2, %v4277_v2  ;;  %v1063_v6 = vsel %vm705_vm2, %v1040_v51, 0.0  ;;  %v1029_v11 = vsub.f32 %v966_v18, %v1015_v30 }
 0x1df   :  { %v1054_v54 = vadd.f32 %v1053_v53, %v1052_v41  ;;  %v1043_v14 = vmul.f32 %v4283_v31, %v4283_v31  ;;  %v1065_v62 = vsel %vm705_vm2, %v1041_v10, 0.0  ;;  %v1030_v17 = vsub.f32 %v4213_v8, %v1015_v30  ;;  %v1347_v41 = vpop.permute.xlu0 %1346 }
 0x1e0   :  { %v1044_v19 = vmul.f32 %v1028_v5, %v1028_v5  ;;  %v1067_v20 = vsel %vm705_vm2, %v1042_v49, 0.0  ;;  %v1031_v9 = vsub.f32 %v4218_v16, %v1015_v30  ;;  %v1045_v22 = vmul.f32 %v1029_v11, %v1029_v11 }
 0x1e1   :  { %v1056_v61 = vadd.f32 %v1055_v60, %v1054_v54  ;;  %v1069_v23 = vsel %vm705_vm2, %v1043_v14, 0.0  ;;  %v1046_v24 = vmul.f32 %v1030_v17, %v1030_v17  ;;  %v1718_v52 = vsel %vm705_vm2, %v1224_v50, %v1347_v41  ;;  %v1230_v60 = vld [vmem:[#allocation2 + $0xa0] sm:$0x3f] }
 0x1e2   :  { %v1071_v18 = vsel %vm705_vm2, %v1044_v19, 0.0  ;;  %v1047_v33 = vmul.f32 %v1031_v9, %v1031_v9  ;;  %v1073_v56 = vsel %vm705_vm2, %v1045_v22, 0.0 }
 0x1e3   :  { %v1058_v0 = vadd.f32 %v1057_v13, %v1056_v61  ;;  %v1075_v8 = vsel %vm705_vm2, %v1046_v24, 0.0  ;;  %v1395_v53 = vpop.permute.xlu0 %1394 }
 0x1e4   :  { %v1077_v44 = vsel %vm705_vm2, %v1047_v33, 0.0  ;;  %v4304_v54 = vsel %vm739_vm4, %v1718_v52, %v1395_v53 }
 0x1e5   :  { %v1060_v1 = vadd.f32 %v1059_v3, %v1058_v0 }
 0x1e7   :  { %v1062_v12 = vadd.f32 %v1061_v4, %v1060_v1  ;;  %v4306_v36 = vpop.permute.xlu0 %1596 }
 0x1e9   :  { %v1064_v7 = vadd.f32 %v1063_v6, %v1062_v12  ;;  %v2941_v6 = vld [vmem:[%s4816_s2] ss:$0 sm:$0xff] }
 0x1eb   :  { %v1066_v15 = vadd.f32 %v1065_v62, %v1064_v7  ;;  %v1359_v61 = vpop.permute.xlu0 %1358 }
 0x1ec   :  { %v4309_v13 = vsel %vm705_vm2, %v1230_v60, %v1359_v61  ;;  %v1407_v61 = vpop.permute.xlu1 %1406 }
 0x1ed   :  { %v1068_v21 = vadd.f32 %v1067_v20, %v1066_v15 }
 0x1ef   :  { %v1070_v32 = vadd.f32 %v1069_v23, %v1068_v21 }
 0x1f1   :  { %v1072_v59 = vadd.f32 %v1071_v18, %v1070_v32 }
 0x1f3   :  { %v1074_v25 = vadd.f32 %v1073_v56, %v1072_v59 }
 0x1f5   :  { %v1076_v26 = vadd.f32 %v1075_v8, %v1074_v25 }
 0x1f7   :  { %v1078_v42 = vadd.f32 %v1077_v44, %v1076_v26 }
 0x1f9   :  { %v1079_v28 = vrot.slane %v1078_v42, 4 }
 0x1fb   :  { %v1080_v16 = vadd.f32 %v1079_v28, %v1078_v42 }
 0x1fd   :  { %v1081_v30 = vrot.slane %v1080_v16, 2 }
 0x1ff   :  { %v1082_v58 = vadd.f32 %v1081_v30, %v1080_v16 }
 0x201   :  { %v1083_v29 = vrot.slane %v1082_v58, 1 }
 0x203   :  { %v1084_v47 = vadd.f32 %v1083_v29, %v1082_v58 }
 0x205   :  { %v1085_v48 = vmul.f32 0.0078125, %v1084_v47 }
 0x207   :  { %v1086_v37 = vadd.f32 1e-05, %v1085_v48 }
 0x209   :  { %3382 = vrsqrt.f32 %v1086_v37 }
 0x216   :  { %v3383_v45 = vpop.eup %3382 }
 0x217   :  { %v1088_v0 = vmul.f32 %v3383_v45, %v4226_v27  ;;  %v1089_v51 = vmul.f32 %v3383_v45, %v4229_v38  ;;  %v1090_v3 = vmul.f32 %v3383_v45, %v4232_v40  ;;  %v1091_v1 = vmul.f32 %v3383_v45, %v4235_v43 }
 0x218   :  { %v1092_v10 = vmul.f32 %v3383_v45, %v4242_v46  ;;  %v1093_v4 = vmul.f32 %v3383_v45, %v4247_v35  ;;  %v1094_v12 = vmul.f32 %v3383_v45, %v4254_v57  ;;  %v1095_v49 = vmul.f32 %v3383_v45, %v4260_v39 }
 0x219   :  { %v1096_v27 = vmul.f32 %v3383_v45, %v4266_v55  ;;  %v1097_v38 = vmul.f32 %v3383_v45, %v4271_v63  ;;  %v1098_v40 = vmul.f32 %v3383_v45, %v4277_v2  ;;  %v1099_v43 = vmul.f32 %v3383_v45, %v4283_v31  ;;  %v2942_v55 = vld [vmem:[%s4817_s3] ss:$0 sm:$0xff]  ;;  %s3398_s3 = smov 40  }
 0x21a   :  { %v1100_v7 = vmul.f32 %v3383_v45, %v1028_v5  ;;  %v1101_v46 = vmul.f32 %v3383_v45, %v1029_v11  ;;  %v1102_v14 = vmul.f32 %v3383_v45, %v1030_v17  ;;  %v1103_v35 = vmul.f32 %v3383_v45, %v1031_v9 }
 0x21b   :  { %v1111_v62 = vmul.f32 %v2941_v6, %v1088_v0  ;;  %v1112_v57 = vmul.f32 %v2941_v6, %v1089_v51  ;;  %v1113_v15 = vmul.f32 %v2941_v6, %v1090_v3  ;;  %v1114_v39 = vmul.f32 %v2941_v6, %v1091_v1 }
 0x21c   :  { %v1115_v19 = vmul.f32 %v2941_v6, %v1092_v10  ;;  %v1116_v20 = vmul.f32 %v2941_v6, %v1093_v4  ;;  %v1117_v21 = vmul.f32 %v2941_v6, %v1094_v12  ;;  %v1118_v22 = vmul.f32 %v2941_v6, %v1095_v49 }
 0x21d   :  { %v1119_v63 = vmul.f32 %v2941_v6, %v1096_v27  ;;  %v1120_v2 = vmul.f32 %v2941_v6, %v1097_v38  ;;  %v1121_v23 = vmul.f32 %v2941_v6, %v1098_v40  ;;  %v1122_v31 = vmul.f32 %v2941_v6, %v1099_v43 }
 0x21e   :  { %v1123_v5 = vmul.f32 %v2941_v6, %v1100_v7  ;;  %v1124_v11 = vmul.f32 %v2941_v6, %v1101_v46  ;;  %v1125_v17 = vmul.f32 %v2941_v6, %v1102_v14  ;;  %v1126_v9 = vmul.f32 %v2941_v6, %v1103_v35 }
 0x21f   :  { %v1134_v32 = vadd.f32 %v2942_v55, %v1111_v62  ;;  %v1135_v24 = vadd.f32 %v2942_v55, %v1112_v57  ;;  %v1136_v18 = vadd.f32 %v2942_v55, %v1113_v15  ;;  %v1137_v59 = vadd.f32 %v2942_v55, %v1114_v39 }
 0x220   :  { %v1138_v33 = vadd.f32 %v2942_v55, %v1115_v19  ;;  %v1139_v56 = vadd.f32 %v2942_v55, %v1116_v20  ;;  %v1140_v25 = vadd.f32 %v2942_v55, %v1117_v21  ;;  %v1141_v8 = vadd.f32 %v2942_v55, %v1118_v22 }
 0x221   :  { %v1142_v26 = vadd.f32 %v2942_v55, %v1119_v63  ;;  %v1143_v44 = vadd.f32 %v2942_v55, %v1120_v2  ;;  %v1144_v42 = vadd.f32 %v2942_v55, %v1121_v23  ;;  %v1145_v28 = vadd.f32 %v2942_v55, %v1122_v31 }
 0x222   :  { %v1146_v16 = vadd.f32 %v2942_v55, %v1123_v5  ;;  %v1147_v30 = vadd.f32 %v2942_v55, %v1124_v11  ;;  %v1148_v58 = vadd.f32 %v2942_v55, %v1125_v17  ;;  %v1149_v29 = vadd.f32 %v2942_v55, %v1126_v9 }
 0x223   :  { %v1152_v47 = vmax.f32 %v1136_v18, 0.0  ;;  %v1153_v48 = vmax.f32 %v1137_v59, 0.0  ;;  %v1154_v37 = vmax.f32 %v1138_v33, 0.0  ;;  %v1155_v50 = vmax.f32 %v1139_v56, 0.0  ;;  %v3378_v59 = vld [vmem:[%s4818_s4 + $0x18] sm:$0xff]  }
 0x224   :  { %v1156_v41 = vmax.f32 %v1140_v25, 0.0  ;;  %v1157_v52 = vmax.f32 %v1141_v8, 0.0  ;;  %v1158_v53 = vmax.f32 %v1142_v26, 0.0  ;;  %v1159_v60 = vmax.f32 %v1143_v44, 0.0  ;;  %v3379_v8 = vld [vmem:[%s4818_s4 + $0x10] sm:$0xff]   ;;  %v3380_v44 = vld [vmem:[%s4818_s4 + $0x8] sm:$0xff]  }
 0x225   :  { %v1160_v45 = vmax.f32 %v1144_v42, 0.0  ;;  %v1161_v0 = vmax.f32 %v1145_v28, 0.0  ;;  %v1162_v51 = vmax.f32 %v1146_v16, 0.0  ;;  %v1163_v3 = vmax.f32 %v1147_v30, 0.0  ;;  %1210 = vst.msk [vmem:[#allocation2 + $0x31] sm:$0xff] %vm705_vm2, %v1152_v47  ;;  %1211 = vst.msk [vmem:[#allocation2 + $0x41] sm:$0xff] %vm705_vm2, %v1153_v48 }
 0x226   :  { %1212 = vst.msk [vmem:[#allocation2 + $0x51] sm:$0xff] %vm705_vm2, %v1154_v37  ;;  %1213 = vst.msk [vmem:[#allocation2 + $0x61] sm:$0xff] %vm705_vm2, %v1155_v50  ;;  %v1164_v1 = vmax.f32 %v1148_v58, 0.0  ;;  %v1165_v10 = vmax.f32 %v1149_v29, 0.0  ;;  %v1151_v4 = vmax.f32 %v1135_v24, 0.0  ;;  %v1150_v12 = vmax.f32 %v1134_v32, 0.0 }
 0x227   :  { %1217 = vst.msk [vmem:[#allocation2 + $0xc1] sm:$0xff] %vm705_vm2, %v1159_v60  ;;  %1214 = vst.msk [vmem:[#allocation2 + $0x71] sm:$0xff] %vm705_vm2, %v1156_v41  ;;  %v4343_v49 = vsel %vm739_vm4, %v4309_v13, %v1407_v61  ;;  %v3377_v32 = vld [vmem:[%s4818_s4 + $0x20] ss:$0 sps:$4 sm:$0xff]  }
 0x228   :  { %1215 = vst.msk [vmem:[#allocation2 + $0x81] sm:$0xff] %vm705_vm2, %v1157_v52  ;;  %1216 = vst.msk [vmem:[#allocation2 + $0xb1] sm:$0xff] %vm705_vm2, %v1158_v53  ;;  %v2243_v24 = vsel %vm2241_vm11, %v3377_v32, 0  ;;  %v3381_v16 = vld [vmem:[%s4818_s4] sm:$0xff]  }
 0x229   :  { %1218 = vst.msk [vmem:[#allocation2 + $0xd1] sm:$0xff] %vm705_vm2, %v1160_v45  ;;  %1219 = vst.msk [vmem:[#allocation2 + $0xe1] sm:$0xff] %vm705_vm2, %v1161_v0  ;;  %3033 = vmatpush3.bf16.msra.mxu1 %v2243_v24  ;;  %2999 = vmatpush3.bf16.msra.mxu0 %v2243_v24 }
 0x22a   :  { %1220 = vst.msk [vmem:[#allocation2 + $0xf1] sm:$0xff] %vm705_vm2, %v1162_v51  ;;  %1221 = vst.msk [vmem:[#allocation2 + $0x101] sm:$0xff] %vm705_vm2, %v1163_v3  ;;  %3029 = vmatprep.subr.bf16.mxu1 %v3394_v34  ;;  %3000 = vmatprep.subr.bf16.mxu0 %v3394_v34 }
 0x22b   :  { %1222 = vst.msk [vmem:[#allocation2 + $0x111] sm:$0xff] %vm705_vm2, %v1164_v1  ;;  %1223 = vst.msk [vmem:[#allocation2 + $0x121] sm:$0xff] %vm705_vm2, %v1165_v10 }
 0x22c   :  { %1209 = vst.msk [vmem:[#allocation2 + $0x21] sm:$0xff] %vm705_vm2, %v1151_v4  ;;  %1208 = vst.msk [vmem:[#allocation2 + $0x11] sm:$0xff] %vm705_vm2, %v1150_v12  ;;  %v1239_v6 = vld [vmem:[#allocation2 + $0x32] sm:$0x3f]  ;;  %v1240_v40 = vld [vmem:[#allocation2 + $0x42] sm:$0x3f]  ;;  %v4427_v4 = vpop.permute.xlu1 %1692 }
 0x22d   :  { %1352 = vrot.lane.b32.xlu1 %v1239_v6, %s3386_s17  ;;  %v1252_v13 = vld [vmem:[#allocation2 + $0x44] sm:$0x3f]  ;;  %v1251_v43 = vld [vmem:[#allocation2 + $0x34] sm:$0x3f]  ;;  %3034 = vmatpush3.bf16.msra.mxu1 %v3378_v59 }
 0x22e   :  { %v1263_v7 = vld [vmem:[#allocation2 + $0x40] sm:$0x3f]  ;;  %v1241_v46 = vld [vmem:[#allocation2 + $0x52] sm:$0x3f]  ;;  %3001 = vmatpush3.bf16.msra.mxu0 %v3378_v59  ;;  %3030 = vmatprep.subr.bf16.mxu1 %v3394_v34 }
 0x22f   :  { %v1265_v14 = vld [vmem:[#allocation2 + $0x60] sm:$0x3f]  ;;  %v1264_v35 = vld [vmem:[#allocation2 + $0x50] sm:$0x3f]  ;;  %3002 = vmatprep.subr.bf16.mxu0 %v3394_v34 }
 0x230   :  { %v1275_v62 = vld [vmem:[#allocation2 + $0x42] sm:$0x3f]  ;;  %v1253_v57 = vld [vmem:[#allocation2 + $0x54] sm:$0x3f] }
 0x231   :  { %v1277_v15 = vld [vmem:[#allocation2 + $0x62] sm:$0x3f]  ;;  %v1276_v39 = vld [vmem:[#allocation2 + $0x52] sm:$0x3f]  ;;  %3035 = vmatpush3.bf16.msra.mxu1 %v3379_v8 }
 0x232   :  { %v1287_v19 = vld [vmem:[#allocation2 + $0x44] sm:$0x3f]  ;;  %v1266_v20 = vld [vmem:[#allocation2 + $0x70] sm:$0x3f]  ;;  %3003 = vmatpush3.bf16.msra.mxu0 %v3379_v8  ;;  %3031 = vmatprep.subr.bf16.mxu1 %v3394_v34 }
 0x233   :  { %v1238_v27 = vld [vmem:[#allocation2 + $0x22] sm:$0x3f]  ;;  %v1288_v22 = vld [vmem:[#allocation2 + $0x54] sm:$0x3f]  ;;  %3004 = vmatprep.subr.bf16.mxu0 %v3394_v34 }
 0x234   :  { %1350 = vrot.lane.b32.xlu0 %v1238_v27, %s3386_s17  ;;  %v1250_v38 = vld [vmem:[#allocation2 + $0x24] sm:$0x3f]  ;;  %v1278_v63 = vld [vmem:[#allocation2 + $0x72] sm:$0x3f] }
 0x235   :  { %1398 = vrot.lane.b32.xlu1 %v1250_v38, %s3389_s23  ;;  %v1289_v21 = vld [vmem:[#allocation2 + $0x64] sm:$0x3f]  ;;  %v1301_v23 = vld [vmem:[#allocation2 + $0x70] sm:$0x3f]  ;;  %3036 = vmatpush3.bf16.msra.mxu1 %v3380_v44  ;;  %v4433_v38 = vpop.permute.xlu1 %1608 }
 0x236   :  { %v1300_v55 = vld [vmem:[#allocation2 + $0x60] sm:$0x3f]  ;;  %v1237_v31 = vld [vmem:[#allocation2 + $0x12] sm:$0x3f]  ;;  %3005 = vmatpush3.bf16.msra.mxu0 %v3380_v44  ;;  %3032 = vmatprep.subr.bf16.mxu1 %v3394_v34 }
 0x237   :  { %v1302_v2 = vld [vmem:[#allocation2 + $0x80] sm:$0x3f]  ;;  %v1290_v5 = vld [vmem:[#allocation2 + $0x74] sm:$0x3f]  ;;  %3006 = vmatprep.subr.bf16.mxu0 %v3394_v34 }
 0x238   :  { %1354 = vrot.lane.b32.xlu0 %v1240_v40, %s3386_s17  ;;  %v1312_v11 = vld [vmem:[#allocation2 + $0x62] sm:$0x3f]  ;;  %v1313_v17 = vld [vmem:[#allocation2 + $0x72] sm:$0x3f] }
 0x239   :  { %1402 = vrot.lane.b32.xlu1 %v1252_v13, %s3389_s23  ;;  %v1314_v9 = vld [vmem:[#allocation2 + $0x82] sm:$0x3f]  ;;  %v1325_v18 = vld [vmem:[#allocation2 + $0x74] sm:$0x3f]  ;;  %3037 = vmatpush3.bf16.msra.mxu1 %v3381_v16  ;;  %v4436_v13 = vpop.permute.xlu0 %1644 }
 0x23a   :  { %v1249_v33 = vld [vmem:[#allocation2 + $0x14] sm:$0x3f]  ;;  %v1261_v56 = vld [vmem:[#allocation2 + $0x20] sm:$0x3f]  ;;  %3007 = vmatpush3.bf16.msra.mxu0 %v3381_v16 }
 0x23b   :  { %v1324_v25 = vld [vmem:[#allocation2 + $0x64] sm:$0x3f]  ;;  %v1255_v26 = vld [vmem:[#allocation2 + $0xb4] sm:$0x3f] }
 0x23c   :  { %1400 = vrot.lane.b32.xlu0 %v1251_v43, %s3389_s23  ;;  %v1326_v42 = vld [vmem:[#allocation2 + $0x84] sm:$0x3f]  ;;  %v1274_v28 = vld [vmem:[#allocation2 + $0x32] sm:$0x3f] }
 0x23d   :  { %1446 = vrot.lane.b32.xlu1 %v1263_v7, %s3391_s13  ;;  %v1243_v30 = vld [vmem:[#allocation2 + $0xb2] sm:$0x3f]  ;;  %v1267_v58 = vld [vmem:[#allocation2 + $0xc0] sm:$0x3f] }
 0x23e   :  { %v1262_v29 = vld [vmem:[#allocation2 + $0x30] sm:$0x3f]  ;;  %v1285_v47 = vld [vmem:[#allocation2 + $0x24] sm:$0x3f] }
 0x23f   :  { %v1273_v48 = vld [vmem:[#allocation2 + $0x22] sm:$0x3f]  ;;  %v1268_v50 = vld [vmem:[#allocation2 + $0xd0] sm:$0x3f] }
 0x240   :  { %1356 = vrot.lane.b32.xlu0 %v1241_v46, %s3386_s17  ;;  %v1279_v37 = vld [vmem:[#allocation2 + $0xc2] sm:$0x3f]  ;;  %v1286_v52 = vld [vmem:[#allocation2 + $0x34] sm:$0x3f] }
 0x241   :  { %1450 = vrot.lane.b32.xlu1 %v1265_v14, %s3391_s13  ;;  %v1298_v41 = vld [vmem:[#allocation2 + $0x40] sm:$0x3f]  ;;  %v1280_v60 = vld [vmem:[#allocation2 + $0xd2] sm:$0x3f] }
 0x242   :  { %v1291_v53 = vld [vmem:[#allocation2 + $0xc4] sm:$0x3f]  ;;  %v1299_v45 = vld [vmem:[#allocation2 + $0x50] sm:$0x3f] }
 0x243   :  { %v1310_v61 = vld [vmem:[#allocation2 + $0x42] sm:$0x3f]  ;;  %v1292_v51 = vld [vmem:[#allocation2 + $0xd4] sm:$0x3f] }
 0x244   :  { %1448 = vrot.lane.b32.xlu0 %v1264_v35, %s3391_s13  ;;  %v1304_v0 = vld [vmem:[#allocation2 + $0xe0] sm:$0x3f]  ;;  %v1311_v1 = vld [vmem:[#allocation2 + $0x52] sm:$0x3f] }
 0x245   :  { %1494 = vrot.lane.b32.xlu1 %v1275_v62, %s3393_s26  ;;  %v1322_v3 = vld [vmem:[#allocation2 + $0x44] sm:$0x3f]  ;;  %v1305_v12 = vld [vmem:[#allocation2 + $0xf0] sm:$0x3f] }
 0x246   :  { %v1316_v10 = vld [vmem:[#allocation2 + $0xe2] sm:$0x3f]  ;;  %v1323_v27 = vld [vmem:[#allocation2 + $0x54] sm:$0x3f] }
 0x247   :  { %v1328_v6 = vld [vmem:[#allocation2 + $0xe4] sm:$0x3f]  ;;  %v1317_v43 = vld [vmem:[#allocation2 + $0xf2] sm:$0x3f] }
 0x248   :  { %1404 = vrot.lane.b32.xlu0 %v1253_v57, %s3389_s23  ;;  %v1244_v40 = vld [vmem:[#allocation2 + $0xc2] sm:$0x3f]  ;;  %v1329_v14 = vld [vmem:[#allocation2 + $0xf4] sm:$0x3f] }
 0x249   :  { %1498 = vrot.lane.b32.xlu1 %v1277_v15, %s3393_s26  ;;  %v1246_v7 = vld [vmem:[#allocation2 + $0xe2] sm:$0x3f]  ;;  %v1257_v62 = vld [vmem:[#allocation2 + $0xd4] sm:$0x3f] }
 0x24a   :  { %v1245_v15 = vld [vmem:[#allocation2 + $0xd2] sm:$0x3f]  ;;  %v1281_v24 = vld [vmem:[#allocation2 + $0xe2] sm:$0x3f] }
 0x24b   :  { %v1295_v59 = vld [vmem:[#allocation2 + $0x104] sm:$0x3f]  ;;  %v1307_v8 = vld [vmem:[#allocation2 + $0x110] sm:$0x3f] }
 0x24c   :  { %1496 = vrot.lane.b32.xlu0 %v1276_v39, %s3393_s26  ;;  %v1294_v44 = vld [vmem:[#allocation2 + $0xf4] sm:$0x3f] }
 0x24d   :  { %1542 = vrot.lane.b32.xlu1 %v1287_v19, %s3398_s3  ;;  %v1269_v19 = vld [vmem:[#allocation2 + $0xe0] sm:$0x3f] }
 0x250   :  { %1452 = vrot.lane.b32.xlu0 %v1266_v20, %s3391_s13 }
 0x251   :  { %1546 = vrot.lane.b32.xlu1 %v1289_v21, %s3398_s3  ;;  %v1256_v21 = vld [vmem:[#allocation2 + $0xc4] sm:$0x3f] }
 0x254   :  { %1544 = vrot.lane.b32.xlu0 %v1288_v22, %s3398_s3 }
 0x255   :  { %1590 = vrot.lane.b32.xlu1 %v1300_v55, %s3395_s0  ;;  %v1271_v55 = vld [vmem:[#allocation2 + $0x100] sm:$0x3f] }
 0x258   :  { %1500 = vrot.lane.b32.xlu0 %v1278_v63, %s3393_s26 }
 0x259   :  { %1594 = vrot.lane.b32.xlu1 %v1302_v2, %s3395_s0  ;;  %v1258_v2 = vld [vmem:[#allocation2 + $0xe4] sm:$0x3f] }
 0x25c   :  { %1592 = vrot.lane.b32.xlu0 %v1301_v23, %s3395_s0 }
 0x25d   :  { %1348 = vrot.lane.b32.xlu1 %v1237_v31, %s3386_s17  ;;  %v1282_v31 = vld [vmem:[#allocation2 + $0xf2] sm:$0x3f] }
 0x260   :  { %1548 = vrot.lane.b32.xlu0 %v1290_v5, %s3398_s3 }
 0x261   :  { %1638 = vrot.lane.b32.xlu1 %v1312_v11, %s3397_s10  ;;  %v1270_v11 = vld [vmem:[#allocation2 + $0xf0] sm:$0x3f] }
 0x264   :  { %1640 = vrot.lane.b32.xlu0 %v1313_v17, %s3397_s10 }
 0x265   :  { %1642 = vrot.lane.b32.xlu1 %v1314_v9, %s3397_s10  ;;  %v1293_v9 = vld [vmem:[#allocation2 + $0xe4] sm:$0x3f] }
 0x268   :  { %1688 = vrot.lane.b32.xlu0 %v1325_v18, %s3396_s8 }
 0x269   :  { %1396 = vrot.lane.b32.xlu1 %v1249_v33, %s3389_s23 }
 0x26c   :  { %1442 = vrot.lane.b32.xlu0 %v1261_v56, %s3391_s13  ;;  %v1283_v56 = vld [vmem:[#allocation2 + $0x102] sm:$0x3f] }
 0x26d   :  { %1686 = vrot.lane.b32.xlu1 %v1324_v25, %s3396_s8 }
 0x270   :  { %1408 = vrot.lane.b32.xlu0 %v1255_v26, %s3389_s23 }
 0x271   :  { %1690 = vrot.lane.b32.xlu1 %v1326_v42, %s3396_s8 }
 0x274   :  { %1492 = vrot.lane.b32.xlu0 %v1274_v28, %s3393_s26  ;;  %v1318_v28 = vld [vmem:[#allocation2 + $0x102] sm:$0x3f] }
 0x275   :  { %1360 = vrot.lane.b32.xlu1 %v1243_v30, %s3386_s17  ;;  %v1306_v30 = vld [vmem:[#allocation2 + $0x100] sm:$0x3f] }
 0x278   :  { %1454 = vrot.lane.b32.xlu0 %v1267_v58, %s3391_s13 }
 0x279   :  { %1444 = vrot.lane.b32.xlu1 %v1262_v29, %s3391_s13  ;;  %v1320_v29 = vld [vmem:[#allocation2 + $0x122] sm:$0x3f] }
 0x27c   :  { %1538 = vrot.lane.b32.xlu0 %v1285_v47, %s3398_s3 }
 0x27d   :  { %1490 = vrot.lane.b32.xlu1 %v1273_v48, %s3393_s26  ;;  %v1308_v48 = vld [vmem:[#allocation2 + $0x120] sm:$0x3f] }
 0x280   :  { %1502 = vrot.lane.b32.xlu0 %v1279_v37, %s3393_s26 }
 0x281   :  { %1456 = vrot.lane.b32.xlu1 %v1268_v50, %s3391_s13  ;;  %v1331_v50 = vld [vmem:[#allocation2 + $0x114] sm:$0x3f] }
 0x284   :  { %1586 = vrot.lane.b32.xlu0 %v1298_v41, %s3395_s0 }
 0x285   :  { %1540 = vrot.lane.b32.xlu1 %v1286_v52, %s3398_s3  ;;  %v1319_v52 = vld [vmem:[#allocation2 + $0x112] sm:$0x3f] }
 0x288   :  { %1550 = vrot.lane.b32.xlu0 %v1291_v53, %s3398_s3 }
 0x289   :  { %1504 = vrot.lane.b32.xlu1 %v1280_v60, %s3393_s26  ;;  %v1247_v60 = vld [vmem:[#allocation2 + $0xf2] sm:$0x3f] }
 0x28c   :  { %1634 = vrot.lane.b32.xlu0 %v1310_v61, %s3397_s10 }
 0x28d   :  { %1588 = vrot.lane.b32.xlu1 %v1299_v45, %s3395_s0  ;;  %v1330_v45 = vld [vmem:[#allocation2 + $0x104] sm:$0x3f] }
 0x290   :  { %1598 = vrot.lane.b32.xlu0 %v1304_v0, %s3395_s0 }
 0x291   :  { %1552 = vrot.lane.b32.xlu1 %v1292_v51, %s3398_s3  ;;  %v1272_v51 = vld [vmem:[#allocation2 + $0x110] sm:$0x3f] }
 0x294   :  { %1682 = vrot.lane.b32.xlu0 %v1322_v3, %s3396_s8 }
 0x295   :  { %1636 = vrot.lane.b32.xlu1 %v1311_v1, %s3397_s10  ;;  %v1227_v1 = vld [vmem:[#allocation2 + $0x30] sm:$0x3f] }
 0x298   :  { %1646 = vrot.lane.b32.xlu0 %v1316_v10, %s3397_s10  ;;  %v1834_v10 = vlaneseq }
 0x299   :  { %1600 = vrot.lane.b32.xlu1 %v1305_v12, %s3395_s0  ;;  %v1332_v12 = vld [vmem:[#allocation2 + $0x124] sm:$0x3f] }
 0x29c   :  { %1694 = vrot.lane.b32.xlu0 %v1328_v6, %s3396_s8 }
 0x29d   :  { %1684 = vrot.lane.b32.xlu1 %v1323_v27, %s3396_s8  ;;  %v3400_v27 = vmov 1983009808  }
 0x29f   :  { %v4439_v46 = vpop.permute.xlu1 %1352 }
 0x2a0   :  { %1362 = vrot.lane.b32.xlu0 %v1244_v40, %s3386_s17  ;;  %v1721_v6 = vsel %vm705_vm2, %v1227_v1, %v4439_v46  ;;  %v1832_v40 = vunpack.c.l.s4 %v3400_v27 }
 0x2a1   :  { %1648 = vrot.lane.b32.xlu1 %v1317_v43, %s3397_s10 }
 0x2a4   :  { %1366 = vrot.lane.b32.xlu0 %v1246_v7, %s3386_s17  ;;  %v1229_v7 = vld [vmem:[#allocation2 + $0x50] sm:$0x3f] }
 0x2a5   :  { %1696 = vrot.lane.b32.xlu1 %v1329_v14, %s3396_s8 }
 0x2a6   :  { %v4443_v35 = vpop.permute.xlu0 %1350 }
 0x2a7   :  { %v4445_v57 = vpop.permute.xlu1 %1398 }
 0x2a8   :  { %1412 = vrot.lane.b32.xlu0 %v1257_v62, %s3389_s23 }
 0x2a9   :  { %1364 = vrot.lane.b32.xlu1 %v1245_v15, %s3386_s17 }
 0x2aa   :  { %v4449_v39 = vpop.permute.xlu0 %1354 }
 0x2ab   :  { %v4451_v20 = vpop.permute.xlu1 %1402 }
 0x2ac   :  { %1458 = vrot.lane.b32.xlu0 %v1269_v19, %s3391_s13  ;;  %v1296_v19 = vld [vmem:[#allocation2 + $0x114] sm:$0x3f] }
 0x2ad   :  { %1410 = vrot.lane.b32.xlu1 %v1256_v21, %s3389_s23 }
 0x2ae   :  { %v4455_v22 = vpop.permute.xlu0 %1400 }
 0x2af   :  { %v4457_v63 = vpop.permute.xlu1 %1446  ;;  %v1733_v43 = vsel %vm739_vm4, %v1721_v6, %v4455_v22  ;;  %v1259_v22 = vld [vmem:[#allocation2 + $0xf4] sm:$0x3f] }
 0x2b0   :  { %1462 = vrot.lane.b32.xlu0 %v1271_v55, %s3391_s13  ;;  %v1226_v55 = vld [vmem:[#allocation2 + $0x20] sm:$0x3f] }
 0x2b1   :  { %1414 = vrot.lane.b32.xlu1 %v1258_v2, %s3389_s23 }
 0x2b2   :  { %v4461_v23 = vpop.permute.xlu0 %1356 }
 0x2b3   :  { %v4463_v5 = vpop.permute.xlu1 %1450  ;;  %v1723_v62 = vsel %vm705_vm2, %v1229_v7, %v4461_v23 }
 0x2b4   :  { %1508 = vrot.lane.b32.xlu0 %v1282_v31, %s3393_s26  ;;  %v1835_v31 = vshrl.u32 %v1834_v10, 7 }
 0x2b5   :  { %1460 = vrot.lane.b32.xlu1 %v1270_v11, %s3391_s13  ;;  %v1720_v11 = vsel %vm705_vm2, %v1226_v55, %v4443_v35 }
 0x2b6   :  { %v1449_v17 = vpop.permute.xlu0 %1448 }
 0x2b7   :  { %v4467_v32 = vpop.permute.xlu1 %1494  ;;  %v1745_v15 = vsel %vm773_vm6, %v1733_v43, %v1449_v17 }
 0x2b8   :  { %1554 = vrot.lane.b32.xlu0 %v1293_v9, %s3398_s3  ;;  %v1833_v9 = vunpack.c.0.s8 %v1832_v40 }
 0x2b9   :  { %1506 = vrot.lane.b32.xlu1 %v1281_v24, %s3393_s26  ;;  %v1321_v24 = vld [vmem:[#allocation2 + $0x132] sm:$0x3f] }
 0x2ba   :  { %v1405_v18 = vpop.permute.xlu0 %1404 }
 0x2bb   :  { %v4471_v33 = vpop.permute.xlu1 %1498  ;;  %v1735_v46 = vsel %vm739_vm4, %v1723_v62, %v1405_v18  ;;  %v1732_v18 = vsel %vm739_vm4, %v1720_v11, %v4445_v57 }
 0x2bc   :  { %1558 = vrot.lane.b32.xlu0 %v1295_v59, %s3398_s3  ;;  %v1744_v35 = vsel %vm773_vm6, %v1732_v18, %v4457_v63 }
 0x2bd   :  { %1510 = vrot.lane.b32.xlu1 %v1283_v56, %s3393_s26  ;;  %v1756_v57 = vsel %vm807_vm8, %v1744_v35, %v4467_v32 }
 0x2be   :  { %v1497_v25 = vpop.permute.xlu0 %1496 }
 0x2bf   :  { %v4475_v26 = vpop.permute.xlu1 %1542  ;;  %v1757_v2 = vsel %vm807_vm8, %v1745_v15, %v1497_v25 }
 0x2c0   :  { %1604 = vrot.lane.b32.xlu0 %v1307_v8, %s3395_s0  ;;  %v1769_v63 = vsel %vm1766_vm13, %v1756_v57, %v4475_v26 }
 0x2c1   :  { %1556 = vrot.lane.b32.xlu1 %v1294_v44, %s3398_s3 }
 0x2c2   :  { %v1453_v42 = vpop.permute.xlu0 %1452 }
 0x2c3   :  { %v4479_v16 = vpop.permute.xlu1 %1546  ;;  %v1747_v23 = vsel %vm773_vm6, %v1735_v46, %v1453_v42 }
 0x2c4   :  { %1650 = vrot.lane.b32.xlu0 %v1318_v28, %s3397_s10  ;;  %v1228_v28 = vld [vmem:[#allocation2 + $0x40] sm:$0x3f] }
 0x2c5   :  { %1602 = vrot.lane.b32.xlu1 %v1306_v30, %s3395_s0 }
 0x2c6   :  { %v1545_v58 = vpop.permute.xlu0 %1544 }
 0x2c7   :  { %v4483_v47 = vpop.permute.xlu1 %1590  ;;  %v1770_v17 = vsel %vm1766_vm13, %v1757_v2, %v1545_v58  ;;  %v1284_v58 = vld [vmem:[#allocation2 + $0x112] sm:$0x3f] }
 0x2c8   :  { %1654 = vrot.lane.b32.xlu0 %v1320_v29, %s3397_s10  ;;  %v1722_v29 = vsel %vm705_vm2, %v1228_v28, %v4449_v39  ;;  %v1782_v32 = vsel %vm1779_vm14, %v1769_v63, %v4483_v47 }
 0x2c9   :  { %1606 = vrot.lane.b32.xlu1 %v1308_v48, %s3395_s0  ;;  %v4530_v48 = vsub.s32 %v1833_v9, %v1835_v31 }
 0x2ca   :  { %v1501_v37 = vpop.permute.xlu0 %1500 }
 0x2cb   :  { %v4487_v41 = vpop.permute.xlu1 %1594  ;;  %v1759_v59 = vsel %vm807_vm8, %v1747_v23, %v1501_v37  ;;  %v1734_v37 = vsel %vm739_vm4, %v1722_v29, %v4451_v20 }
 0x2cc   :  { %1700 = vrot.lane.b32.xlu0 %v1331_v50, %s3396_s8  ;;  %v1746_v39 = vsel %vm773_vm6, %v1734_v37, %v4463_v5 }
 0x2cd   :  { %1652 = vrot.lane.b32.xlu1 %v1319_v52, %s3397_s10  ;;  %v1758_v20 = vsel %vm807_vm8, %v1746_v39, %v4471_v33 }
 0x2ce   :  { %v1593_v53 = vpop.permute.xlu0 %1592  ;;  %v1771_v47 = vsel %vm1766_vm13, %v1758_v20, %v4479_v16 }
 0x2cf   :  { %v4491_v61 = vpop.permute.xlu1 %1348  ;;  %v1783_v56 = vsel %vm1779_vm14, %v1770_v17, %v1593_v53  ;;  %v1333_v53 = vld [vmem:[#allocation2 + $0x134] sm:$0x3f]  ;;  %v1784_v5 = vsel %vm1779_vm14, %v1771_v47, %v4487_v41 }
 0x2d0   :  { %1368 = vrot.lane.b32.xlu0 %v1247_v60, %s3386_s17 }
 0x2d1   :  { %1698 = vrot.lane.b32.xlu1 %v1330_v45, %s3396_s8 }
 0x2d2   :  { %v1549_v0 = vpop.permute.xlu0 %1548 }
 0x2d3   :  { %v1639_v3 = vpop.permute.xlu1 %1638  ;;  %v1772_v8 = vsel %vm1766_vm13, %v1759_v59, %v1549_v0 }
 0x2d4   :  { %1464 = vrot.lane.b32.xlu0 %v1272_v51, %s3391_s13  ;;  %v1785_v50 = vsel %vm1779_vm14, %v1772_v8, %v4306_v36  ;;  %v1795_v26 = vsel %vm1792_vm15, %v1782_v32, %v1639_v3 }
 0x2d5   :  { %1702 = vrot.lane.b32.xlu1 %v1332_v12, %s3396_s8  ;;  %v1798_v36 = vsel %vm1792_vm15, %v1785_v50, %v4436_v13  ;;  %v1225_v50 = vld [vmem:[#allocation2 + $0x10] sm:$0x3f] }
 0x2d6   :  { %v1641_v14 = vpop.permute.xlu0 %1640  ;;  %v4560_v16 = vsel %vm1805_vm0, %v1798_v36, %v4427_v4 }
 0x2d7   :  { %v1643_v21 = vpop.permute.xlu1 %1642  ;;  %v1796_v44 = vsel %vm1792_vm15, %v1783_v56, %v1641_v14  ;;  %v4566_v62 = vrot.slane %v4560_v16, %v4530_v48 }
 0x2d8   :  { %1560 = vrot.lane.b32.xlu0 %v1296_v19, %s3398_s3  ;;  %v1797_v33 = vsel %vm1792_vm15, %v1784_v5, %v1643_v21 }
 0x2d9   :  { %1416 = vrot.lane.b32.xlu1 %v1259_v22, %s3389_s23 }
 0x2da   :  { %v1689_v25 = vpop.permute.xlu0 %1688 }
 0x2db   :  { %v4520_v42 = vpop.permute.xlu1 %1396  ;;  %v1809_v30 = vsel %vm1805_vm0, %v1796_v44, %v1689_v25 }
 0x2dc   :  { %1656 = vrot.lane.b32.xlu0 %v1321_v24, %s3397_s10  ;;  %v1878_v60 = vcombine.high %v1809_v30, %v1809_v30  ;;  %v1885_v45 = vrot.slane %v1809_v30, %v4530_v48 }
 0x2dd   :  { %1512 = vrot.lane.b32.xlu1 %v1284_v58, %s3393_s26 }
 0x2de   :  { %v1443_v52 = vpop.permute.xlu0 %1442  ;;  %v1892_v10 = vrot.slane %v1878_v60, %v4530_v48  ;;  %v1893_v12 = vcombine.high %v1885_v45, %v1885_v45 }
 0x2df   :  { %v1687_v0 = vpop.permute.xlu1 %1686  ;;  %v1742_v58 = vsel %vm773_vm6, %v4304_v54, %v1443_v52 }
 0x2e0   :  { %v1808_v51 = vsel %vm1805_vm0, %v1795_v26, %v1687_v0  ;;  %v2057_v14 = vcombine.low %v1893_v12, %v1892_v10  ;;  %v1719_v26 = vsel %vm705_vm2, %v1225_v50, %v4491_v61 }
 0x2e1   :  { %v1862_v1 = vcombine.high %v1808_v51, %v1808_v51  ;;  %1704 = vrot.lane.b32.xlu1 %v1333_v53, %s3396_s8  ;;  %v1731_v0 = vsel %vm739_vm4, %v1719_v26, %v4520_v42  ;;  %v1869_v20 = vrot.slane %v1808_v51, %v4530_v48  ;;  %v1231_v42 = vld [vmem:[#allocation2 + $0xb0] sm:$0x3f] }
 0x2e2   :  { %v4553_v3 = vpop.permute.xlu0 %1408  ;;  %v2071_v31 = vrot.slane %v2057_v14, %v4530_v48 }
 0x2e3   :  { %v1876_v6 = vrot.slane %v1862_v1, %v4530_v48  ;;  %v1691_v27 = vpop.permute.xlu1 %1690  ;;  %v1877_v51 = vcombine.high %v1869_v20, %v1869_v20 }
 0x2e4   :  { %v1810_v13 = vsel %vm1805_vm0, %v1797_v33, %v1691_v27 }
 0x2e5   :  { %v2056_v40 = vcombine.low %v1876_v6, %v1885_v45  ;;  %v1894_v43 = vcombine.high %v1810_v13, %v1810_v13  ;;  %v1901_v41 = vrot.slane %v1810_v13, %v4530_v48 }
 0x2e6   :  { %v1493_v7 = vpop.permute.xlu0 %1492 }
 0x2e7   :  { %v1908_v15 = vrot.slane %v1894_v43, %v4530_v48  ;;  %v1909_v19 = vcombine.high %v1901_v41, %v1901_v41  ;;  %v1361_v21 = vpop.permute.xlu1 %1360  ;;  %v2064_v55 = vrot.slane %v2056_v40, %v4530_v48 }
 0x2e8   :  { %v1725_v13 = vsel %vm705_vm2, %v1231_v42, %v1361_v21 }
 0x2e9   :  { %v2073_v4 = vcombine.low %v1901_v41, %v1909_v19  ;;  %v2074_v46 = vcombine.low %v1908_v15, %v4566_v62  ;;  %v2072_v9 = vcombine.low %v2064_v55, %v2071_v31  ;;  %v1910_v31 = vcombine.high %v4560_v16, %v4560_v16 }
 0x2ea   :  { %v1455_v2 = vpop.permute.xlu0 %1454 }
 0x2eb   :  { %v2081_v22 = vrot.slane %v2073_v4, %v4530_v48  ;;  %v2088_v11 = vrot.slane %v2074_v46, %v4530_v48  ;;  %v1445_v23 = vpop.permute.xlu1 %1444  ;;  %v1748_v47 = vsel %vm773_vm6, %v4343_v49, %v1455_v2  ;;  %v1737_v4 = vsel %vm739_vm4, %v1725_v13, %v4553_v3 }
 0x2ec   :  { %v1743_v52 = vsel %vm773_vm6, %v1731_v0, %v1445_v23 }
 0x2ed   :  { %v2089_v17 = vcombine.low %v2081_v22, %v2088_v11  ;;  %v1755_v12 = vsel %vm807_vm8, %v1743_v52, %v1493_v7  ;;  %v2040_v22 = vcombine.low %v1869_v20, %v1877_v51 }
 0x2ee   :  { %v1539_v24 = vpop.permute.xlu0 %1538 }
 0x2ef   :  { %v1491_v18 = vpop.permute.xlu1 %1490  ;;  %v2185_v59 = vpack.c.bf16 %v2089_v17, %v2072_v9 }
 0x2f0   :  { %v1754_v29 = vsel %vm807_vm8, %v1742_v58, %v1491_v18 }
 0x2f1   :  { %3013 = vmatmul.mubr.msk.bf16.vlgmr.msra.gmra.mxu1 %vm2225_vm1, %v2185_v59  ;;  %v1767_v32 = vsel %vm1766_vm13, %v1754_v29, %v1539_v24  ;;  %v2054_v29 = vrot.slane %v2040_v22, %v4530_v48 }
 0x2f2   :  { %v1503_v56 = vpop.permute.xlu0 %1502  ;;  %3016 = vmatprep.mubr.msk.bf16.mxu1 %vm3399_vm12, %v3394_v34 }
 0x2f3   :  { %v1457_v25 = vpop.permute.xlu1 %1456  ;;  %v1760_v1 = vsel %vm807_vm8, %v1748_v47, %v1503_v56 }
 0x2f4   :  { %v1749_v11 = vsel %vm773_vm6, %v1737_v4, %v1457_v25  ;;  %v1925_v25 = vcombine.high %v4566_v62, %v4566_v62  ;;  %v1233_v4 = vld [vmem:[#allocation2 + $0xd0] sm:$0x3f] }
 0x2f6   :  { %v1587_v35 = vpop.permute.xlu0 %1586 }
 0x2f7   :  { %v1541_v8 = vpop.permute.xlu1 %1540  ;;  %v1780_v53 = vsel %vm1779_vm14, %v1767_v32, %v1587_v35 }
 0x2f8   :  { %v1768_v33 = vsel %vm1766_vm13, %v1755_v12, %v1541_v8 }
 0x2fa   :  { %v1551_v44 = vpop.permute.xlu0 %1550 }
 0x2fb   :  { %v1505_v28 = vpop.permute.xlu1 %1504  ;;  %v1773_v10 = vsel %vm1766_vm13, %v1760_v1, %v1551_v44 }
 0x2fc   :  { %v1761_v3 = vsel %vm807_vm8, %v1749_v11, %v1505_v28 }
 0x2fe   :  { %v1635_v57 = vpop.permute.xlu0 %1634 }
 0x2ff   :  { %v1589_v30 = vpop.permute.xlu1 %1588  ;;  %v1793_v60 = vsel %vm1792_vm15, %v1780_v53, %v1635_v57  ;;  %v1924_v57 = vrot.slane %v1910_v31, %v4530_v48 }
 0x300   :  { %v1781_v49 = vsel %vm1779_vm14, %v1768_v33, %v1589_v30 }
 0x301   :  { %v2090_v0 = vcombine.low %v1925_v25, %v1924_v57 }
 0x302   :  { %v1599_v63 = vpop.permute.xlu0 %1598 }
 0x303   :  { %v1553_v37 = vpop.permute.xlu1 %1552  ;;  %v1786_v6 = vsel %vm1779_vm14, %v1773_v10, %v1599_v63  ;;  %v2098_v12 = vrot.slane %v2090_v0, %v4530_v48 }
 0x304   :  { %v1774_v8 = vsel %vm1766_vm13, %v1761_v3, %v1553_v37 }
 0x306   :  { %v1683_v39 = vpop.permute.xlu0 %1682 }
 0x307   :  { %v1637_v45 = vpop.permute.xlu1 %1636  ;;  %v1806_v54 = vsel %vm1805_vm0, %v1793_v60, %v1683_v39 }
 0x308   :  { %v1837_v61 = vrot.slane %v1806_v54, %v4530_v48  ;;  %v1830_v27 = vcombine.high %v1806_v54, %v1806_v54  ;;  %v1794_v14 = vsel %vm1792_vm15, %v1781_v49, %v1637_v45 }
 0x30a   :  { %v1647_v36 = vpop.permute.xlu0 %1646  ;;  %v1845_v41 = vcombine.high %v1837_v61, %v1837_v61  ;;  %v1844_v21 = vrot.slane %v1830_v27, %v4530_v48 }
 0x30b   :  { %v1601_v5 = vpop.permute.xlu1 %1600  ;;  %v1799_v40 = vsel %vm1792_vm15, %v1786_v6, %v1647_v36 }
 0x30c   :  { %v2022_v17 = vcombine.low %v1837_v61, %v1845_v41  ;;  %v1787_v30 = vsel %vm1779_vm14, %v1774_v8, %v1601_v5 }
 0x30e   :  { %v1695_v43 = vpop.permute.xlu0 %1694  ;;  %v2030_v63 = vrot.slane %v2022_v17, %v4530_v48 }
 0x30f   :  { %v1812_v15 = vsel %vm1805_vm0, %v1799_v40, %v1695_v43  ;;  %v1685_v7 = vpop.permute.xlu1 %1684 }
 0x310   :  { %v1933_v19 = vrot.slane %v1812_v15, %v4530_v48  ;;  %v1807_v55 = vsel %vm1805_vm0, %v1794_v14, %v1685_v7  ;;  %v1926_v56 = vcombine.high %v1812_v15, %v1812_v15 }
 0x311   :  { %v1846_v46 = vcombine.high %v1807_v55, %v1807_v55  ;;  %v1853_v2 = vrot.slane %v1807_v55, %v4530_v48 }
 0x312   :  { %v4612_v23 = vpop.permute.xlu0 %1362  ;;  %v1941_v35 = vcombine.high %v1933_v19, %v1933_v19  ;;  %v1940_v50 = vrot.slane %v1926_v56, %v4530_v48 }
 0x313   :  { %v1860_v9 = vrot.slane %v1846_v46, %v4530_v48  ;;  %v1861_v24 = vcombine.high %v1853_v2, %v1853_v2  ;;  %v2023_v18 = vcombine.low %v1844_v21, %v1853_v2  ;;  %v1649_v59 = vpop.permute.xlu1 %1648  ;;  %v1232_v2 = vld [vmem:[#allocation2 + $0xc0] sm:$0x3f] }
 0x314   :  { %v1800_v32 = vsel %vm1792_vm15, %v1787_v30, %v1649_v59  ;;  %v2091_v53 = vcombine.low %v1933_v19, %v1941_v35  ;;  %v1726_v22 = vsel %vm705_vm2, %v1232_v2, %v4612_v23 }
 0x315   :  { %v2037_v44 = vrot.slane %v2023_v18, %v4530_v48  ;;  %v2039_v16 = vcombine.low %v1861_v24, %v1860_v9  ;;  %v1234_v18 = vld [vmem:[#allocation2 + $0xe0] sm:$0x3f] }
 0x316   :  { %v1367_v58 = vpop.permute.xlu0 %1366  ;;  %v2105_v61 = vrot.slane %v2091_v53, %v4530_v48 }
 0x317   :  { %v2047_v28 = vrot.slane %v2039_v16, %v4530_v48  ;;  %v1697_v37 = vpop.permute.xlu1 %1696  ;;  %v2038_v26 = vcombine.low %v2030_v63, %v2037_v44  ;;  %v1728_v59 = vsel %vm705_vm2, %v1234_v18, %v1367_v58 }
 0x318   :  { %v1813_v39 = vsel %vm1805_vm0, %v1800_v32, %v1697_v37  ;;  %v2106_v27 = vcombine.low %v2098_v12, %v2105_v61 }
 0x319   :  { %v2055_v60 = vcombine.low %v2047_v28, %v2054_v29  ;;  %v1942_v62 = vcombine.high %v1813_v39, %v1813_v39  ;;  %v1949_v45 = vrot.slane %v1813_v39, %v4530_v48 }
 0x31a   :  { %v1413_v54 = vpop.permute.xlu0 %1412 }
 0x31b   :  { %v2184_v52 = vpack.c.bf16 %v2055_v60, %v2038_v26  ;;  %v1956_v20 = vrot.slane %v1942_v62, %v4530_v48  ;;  %v1957_v47 = vcombine.high %v1949_v45, %v1949_v45  ;;  %v2107_v36 = vcombine.low %v1940_v50, %v1949_v45  ;;  %v1365_v1 = vpop.permute.xlu1 %1364 }
 0x31c   :  { %v1727_v46 = vsel %vm705_vm2, %v1233_v4, %v1365_v1 }
 0x31d   :  { %v2108_v5 = vcombine.low %v1957_v47, %v1956_v20  ;;  %3009 = vmatmul.mubr.msk.bf16.vlgmr.msra.gmra.mxu0 %vm2225_vm1, %v2184_v52  ;;  %v2115_v42 = vrot.slane %v2107_v36, %v4530_v48  ;;  %v1739_v11 = vsel %vm739_vm4, %v1727_v46, %v1413_v54 }
 0x31e   :  { %v1459_v10 = vpop.permute.xlu0 %1458 }
 0x31f   :  { %v2122_v33 = vrot.slane %v2108_v5, %v4530_v48  ;;  %v1411_v6 = vpop.permute.xlu1 %1410 }
 0x320   :  { %v1738_v9 = vsel %vm739_vm4, %v1726_v22, %v1411_v6 }
 0x321   :  { %v2123_v51 = vcombine.low %v2115_v42, %v2122_v33  ;;  %v1750_v35 = vsel %vm773_vm6, %v1738_v9, %v1459_v10 }
 0x322   :  { %v1463_v13 = vpop.permute.xlu0 %1462 }
 0x323   :  { %v1415_v49 = vpop.permute.xlu1 %1414  ;;  %v2186_v40 = vpack.c.bf16 %v2123_v51, %v2106_v27  ;;  %v1235_v27 = vld [vmem:[#allocation2 + $0xf0] sm:$0x3f] }
 0x324   :  { %v1740_v56 = vsel %vm739_vm4, %v1728_v59, %v1415_v49 }
 0x325   :  { %3017 = vmatmul.mubr.msk.bf16.gmra.mxu1 %vm2225_vm1, %v2186_v40  ;;  %v1752_v57 = vsel %vm773_vm6, %v1740_v56, %v1463_v13 }
 0x326   :  { %v1509_v43 = vpop.permute.xlu0 %1508  ;;  %3020 = vmatprep.mubr.msk.bf16.mxu1 %vm3399_vm12, %v3394_v34 }
 0x327   :  { %v1461_v41 = vpop.permute.xlu1 %1460 }
 0x328   :  { %v1751_v24 = vsel %vm773_vm6, %v1739_v11, %v1461_v41 }
 0x329   :  { %v1763_v8 = vsel %vm807_vm8, %v1751_v24, %v1509_v43 }
 0x32a   :  { %v1555_v14 = vpop.permute.xlu0 %1554 }
 0x32b   :  { %v1507_v15 = vpop.permute.xlu1 %1506 }
 0x32c   :  { %v1762_v23 = vsel %vm807_vm8, %v1750_v35, %v1507_v15 }
 0x32d   :  { %v1775_v29 = vsel %vm1766_vm13, %v1762_v23, %v1555_v14 }
 0x32e   :  { %v1559_v7 = vpop.permute.xlu0 %1558 }
 0x32f   :  { %v1511_v19 = vpop.permute.xlu1 %1510 }
 0x330   :  { %v1764_v30 = vsel %vm807_vm8, %v1752_v57, %v1511_v19 }
 0x331   :  { %v1777_v50 = vsel %vm1766_vm13, %v1764_v30, %v1559_v7 }
 0x332   :  { %v1605_v55 = vpop.permute.xlu0 %1604 }
 0x333   :  { %v1557_v21 = vpop.permute.xlu1 %1556 }
 0x334   :  { %v1776_v16 = vsel %vm1766_vm13, %v1763_v8, %v1557_v21 }
 0x335   :  { %v1789_v58 = vsel %vm1779_vm14, %v1776_v16, %v1605_v55 }
 0x336   :  { %v1651_v31 = vpop.permute.xlu0 %1650 }
 0x337   :  { %v1603_v17 = vpop.permute.xlu1 %1602 }
 0x338   :  { %v1788_v28 = vsel %vm1779_vm14, %v1775_v29, %v1603_v17 }
 0x339   :  { %v1801_v62 = vsel %vm1792_vm15, %v1788_v28, %v1651_v31 }
 0x33a   :  { %v1655_v3 = vpop.permute.xlu0 %1654 }
 0x33b   :  { %v1607_v44 = vpop.permute.xlu1 %1606 }
 0x33c   :  { %v1790_v39 = vsel %vm1779_vm14, %v1777_v50, %v1607_v44 }
 0x33d   :  { %v1803_v47 = vsel %vm1792_vm15, %v1790_v39, %v1655_v3 }
 0x33e   :  { %v1701_v25 = vpop.permute.xlu0 %1700 }
 0x33f   :  { %v1653_v63 = vpop.permute.xlu1 %1652 }
 0x340   :  { %v1802_v32 = vsel %vm1792_vm15, %v1789_v58, %v1653_v63 }
 0x341   :  { %v1815_v37 = vsel %vm1805_vm0, %v1802_v32, %v1701_v25 }
 0x342   :  { %v1369_v53 = vpop.permute.xlu0 %1368  ;;  %v1974_v26 = vcombine.high %v1815_v37, %v1815_v37  ;;  %v1981_v60 = vrot.slane %v1815_v37, %v4530_v48 }
 0x343   :  { %v1699_v45 = vpop.permute.xlu1 %1698  ;;  %v1729_v51 = vsel %vm705_vm2, %v1235_v27, %v1369_v53 }
 0x344   :  { %v1814_v0 = vsel %vm1805_vm0, %v1801_v62, %v1699_v45  ;;  %v1988_v36 = vrot.slane %v1974_v26, %v4530_v48  ;;  %v1989_v1 = vcombine.high %v1981_v60, %v1981_v60 }
 0x345   :  { %v1958_v54 = vcombine.high %v1814_v0, %v1814_v0  ;;  %v1965_v52 = vrot.slane %v1814_v0, %v4530_v48 }
 0x346   :  { %v1465_v20 = vpop.permute.xlu0 %1464  ;;  %v2141_v13 = vcombine.low %v1989_v1, %v1988_v36 }
 0x347   :  { %v1972_v61 = vrot.slane %v1958_v54, %v4530_v48  ;;  %v1973_v5 = vcombine.high %v1965_v52, %v1965_v52  ;;  %v1703_v10 = vpop.permute.xlu1 %1702 }
 0x348   :  { %v1816_v12 = vsel %vm1805_vm0, %v1803_v47, %v1703_v10  ;;  %v2149_v19 = vrot.slane %v2141_v13, %v4530_v48 }
 0x349   :  { %v2124_v42 = vcombine.low %v1965_v52, %v1973_v5  ;;  %v2125_v33 = vcombine.low %v1972_v61, %v1981_v60  ;;  %v1997_v6 = vrot.slane %v1816_v12, %v4530_v48  ;;  %v1990_v22 = vcombine.high %v1816_v12, %v1816_v12 }
 0x34a   :  { %v1561_v43 = vpop.permute.xlu0 %1560 }
 0x34b   :  { %v2005_v49 = vcombine.high %v1997_v6, %v1997_v6  ;;  %v1417_v40 = vpop.permute.xlu1 %1416  ;;  %v2132_v14 = vrot.slane %v2124_v42, %v4530_v48  ;;  %v2139_v15 = vrot.slane %v2125_v33, %v4530_v48  ;;  %v2004_v56 = vrot.slane %v1990_v22, %v4530_v48 }
 0x34c   :  { %v1741_v41 = vsel %vm739_vm4, %v1729_v51, %v1417_v40 }
 0x34d   :  { %v2142_v7 = vcombine.low %v1997_v6, %v2005_v49  ;;  %v1753_v4 = vsel %vm773_vm6, %v1741_v41, %v1465_v20  ;;  %v2140_v31 = vcombine.low %v2132_v14, %v2139_v15 }
 0x34e   :  { %v1657_v2 = vpop.permute.xlu0 %1656 }
 0x34f   :  { %v2156_v55 = vrot.slane %v2142_v7, %v4530_v48  ;;  %v1513_v21 = vpop.permute.xlu1 %1512 }
 0x350   :  { %v1765_v46 = vsel %vm807_vm8, %v1753_v4, %v1513_v21 }
 0x351   :  { %v2157_v11 = vcombine.low %v2149_v19, %v2156_v55  ;;  %v1778_v17 = vsel %vm1766_vm13, %v1765_v46, %v1561_v43 }
 0x352   :  { %v1791_v9 = vsel %vm1779_vm14, %v1778_v17, %v4433_v38 }
 0x353   :  { %v1804_v24 = vsel %vm1792_vm15, %v1791_v9, %v1657_v2  ;;  %v1705_v18 = vpop.permute.xlu1 %1704  ;;  %v2187_v59 = vpack.c.bf16 %v2157_v11, %v2140_v31 }
 0x354   :  { %v1817_v3 = vsel %vm1805_vm0, %v1804_v24, %v1705_v18 }
 0x355   :  { %v2006_v35 = vcombine.high %v1817_v3, %v1817_v3  ;;  %v2013_v8 = vrot.slane %v1817_v3, %v4530_v48  ;;  %3021 = vmatmul.mubr.msk.bf16.gmra.mxu1 %vm2225_vm1, %v2187_v59 }
 0x356   :  { %3024 = vmatprep.mubr.msk.bf16.mxu1 %vm3399_vm12, %v3394_v34 }
 0x357   :  { %v2020_v44 = vrot.slane %v2006_v35, %v4530_v48  ;;  %v2021_v23 = vcombine.high %v2013_v8, %v2013_v8  ;;  %v2158_v38 = vcombine.low %v2004_v56, %v2013_v8 }
 0x359   :  { %v2159_v16 = vcombine.low %v2021_v23, %v2020_v44  ;;  %v2166_v57 = vrot.slane %v2158_v38, %v4530_v48 }
 0x35b   :  { %v2173_v25 = vrot.slane %v2159_v16, %v4530_v48 }
 0x35d   :  { %v2174_v30 = vcombine.low %v2166_v57, %v2173_v25 }
 0x35f   :  { %v2188_v29 = vpack.c.bf16 %v2174_v30, %v2174_v30 }
 0x361   :  { %3025 = vmatmul.mubr.msk.bf16.gmra.mxu1 %vm2225_vm1, %v2188_v29 }
 0x3b1   :  { %v2287_v58 = vpop.f32.mrf.mxu1 }
 0x3b2   :  { %v2320_v52 = vsel %vm705_vm2, %v2287_v58, 0.0 }
 0x3b3   :  { %v3014_v63 = vpop.f32.mrf.mxu1 }
 0x3b5   :  { %v2290_v28 = vpop.f32.mrf.mxu1 }
 0x3b6   :  { %v2322_v47 = vsel %vm705_vm2, %v2290_v28, 0.0 }
 0x3b7   :  { %v3015_v32 = vpop.f32.mrf.mxu1 }
 0x3dd   :  { %v2279_v37 = vpop.f32.mrf.mxu0 }
 0x3de   :  { %v2317_v0 = vsel %vm705_vm2, %v2279_v37, 0.0 }
 0x3df   :  { %v3010_v50 = vpop.f32.mrf.mxu0 }
 0x3e1   :  { %v2282_v34 = vpop.f32.mrf.mxu0 }
 0x3e2   :  { %v2318_v45 = vsel %vm705_vm2, %v2282_v34, 0.0 }
 0x3e3   :  { %v3011_v53 = vpop.f32.mrf.mxu0  ;;  %v2319_v54 = vadd.f32 %v2318_v45, %v2317_v0 }
 0x3e5   :  { %v2295_v39 = vpop.f32.mrf.mxu1  ;;  %v2321_v20 = vadd.f32 %v2320_v52, %v2319_v54 }
 0x3e6   :  { %v2324_v5 = vsel %vm705_vm2, %v2295_v39, 0.0 }
 0x3e7   :  { %v3018_v26 = vpop.f32.mrf.mxu1  ;;  %v2323_v36 = vadd.f32 %v2322_v47, %v2321_v20 }
 0x3e9   :  { %v2298_v60 = vpop.f32.mrf.mxu1  ;;  %v2325_v10 = vadd.f32 %v2324_v5, %v2323_v36 }
 0x3ea   :  { %v2326_v42 = vsel %vm705_vm2, %v2298_v60, 0.0 }
 0x3eb   :  { %v3019_v62 = vpop.f32.mrf.mxu1  ;;  %v2327_v27 = vadd.f32 %v2326_v42, %v2325_v10 }
 0x415   :  { %v2303_v1 = vpop.f32.mrf.mxu1 }
 0x416   :  { %v2328_v6 = vsel %vm705_vm2, %v2303_v1, 0.0 }
 0x417   :  { %v3022_v61 = vpop.f32.mrf.mxu1  ;;  %v2329_v13 = vadd.f32 %v2328_v6, %v2327_v27 }
 0x419   :  { %v2306_v12 = vpop.f32.mrf.mxu1 }
 0x41a   :  { %v2330_v51 = vsel %vm705_vm2, %v2306_v12, 0.0 }
 0x41b   :  { %v3023_v33 = vpop.f32.mrf.mxu1  ;;  %v2331_v49 = vadd.f32 %v2330_v51, %v2329_v13 }
 0x41c   :  { %v2953_v33 = vld [vmem:[%s4819_s5] ss:$0 sm:$0xff] }
 0x421   :  { %v2311_v40 = vpop.f32.mrf.mxu1 }
 0x422   :  { %v2332_v43 = vsel %vm705_vm2, %v2311_v40, 0.0 }
 0x423   :  { %v2333_v41 = vadd.f32 %v2332_v43, %v2331_v49  ;;  %v3026_v14 = vpop.f32.mrf.mxu1 }
 0x424   :  { %v2954_v14 = vld [vmem:[%s4820_s6] ss:$0 sm:$0xff] }
 0x425   :  { %v2334_v15 = vrot.slane %v2333_v41, 4  ;;  %v2314_v7 = vpop.f32.mrf.mxu1 }
 0x427   :  { %v2335_v19 = vadd.f32 %v2334_v15, %v2333_v41  ;;  %v3027_v55 = vpop.f32.mrf.mxu1 }
 0x429   :  { %v2336_v4 = vrot.slane %v2335_v19, 2 }
 0x42b   :  { %v2337_v21 = vadd.f32 %v2336_v4, %v2335_v19 }
 0x42d   :  { %v2338_v46 = vrot.slane %v2337_v21, 1 }
 0x42f   :  { %v2339_v2 = vadd.f32 %v2338_v46, %v2337_v21 }
 0x431   :  { %v2340_v31 = vmul.f32 0.013888889, %v2339_v2 }
 0x433   :  { %v2341_v22 = vsub.f32 %v2279_v37, %v2340_v31  ;;  %v2342_v11 = vsub.f32 %v2282_v34, %v2340_v31  ;;  %v2343_v17 = vsub.f32 %v2287_v58, %v2340_v31  ;;  %v2344_v9 = vsub.f32 %v2290_v28, %v2340_v31 }
 0x434   :  { %v2345_v24 = vsub.f32 %v2295_v39, %v2340_v31  ;;  %v2346_v56 = vsub.f32 %v2298_v60, %v2340_v31  ;;  %v2347_v38 = vsub.f32 %v2303_v1, %v2340_v31  ;;  %v2348_v30 = vsub.f32 %v2306_v12, %v2340_v31 }
 0x435   :  { %v2350_v18 = vmul.f32 %v2341_v22, %v2341_v22  ;;  %v2351_v59 = vmul.f32 %v2342_v11, %v2342_v11  ;;  %v2352_v3 = vmul.f32 %v2343_v17, %v2343_v17  ;;  %v2353_v35 = vmul.f32 %v2344_v9, %v2344_v9 }
 0x436   :  { %v2354_v16 = vmul.f32 %v2345_v24, %v2345_v24  ;;  %v2355_v29 = vmul.f32 %v2346_v56, %v2346_v56  ;;  %v2349_v28 = vsub.f32 %v2311_v40, %v2340_v31  ;;  %v2356_v32 = vmul.f32 %v2347_v38, %v2347_v38 }
 0x437   :  { %v2359_v8 = vsel %vm705_vm2, %v2350_v18, 0.0  ;;  %v2360_v44 = vsel %vm705_vm2, %v2351_v59, 0.0  ;;  %v2362_v57 = vsel %vm705_vm2, %v2352_v3, 0.0  ;;  %v2364_v58 = vsel %vm705_vm2, %v2353_v35, 0.0 }
 0x438   :  { %v2361_v23 = vadd.f32 %v2360_v44, %v2359_v8  ;;  %v2366_v37 = vsel %vm705_vm2, %v2354_v16, 0.0  ;;  %v2357_v34 = vmul.f32 %v2348_v30, %v2348_v30  ;;  %v2368_v53 = vsel %vm705_vm2, %v2355_v29, 0.0 }
 0x439   :  { %v2358_v26 = vmul.f32 %v2349_v28, %v2349_v28  ;;  %v2370_v60 = vsel %vm705_vm2, %v2356_v32, 0.0 }
 0x43a   :  { %v2363_v25 = vadd.f32 %v2362_v57, %v2361_v23  ;;  %v2372_v45 = vsel %vm705_vm2, %v2357_v34, 0.0 }
 0x43b   :  { %v2374_v54 = vsel %vm705_vm2, %v2358_v26, 0.0  ;;  %vm2801_vm2 = vcmask 62464  }
 0x43c   :  { %v2365_v63 = vadd.f32 %v2364_v58, %v2363_v25 }
 0x43e   :  { %v2367_v50 = vadd.f32 %v2366_v37, %v2365_v63 }
 0x440   :  { %v2369_v39 = vadd.f32 %v2368_v53, %v2367_v50 }
 0x442   :  { %v2371_v62 = vadd.f32 %v2370_v60, %v2369_v39 }
 0x444   :  { %v2373_v0 = vadd.f32 %v2372_v45, %v2371_v62 }
 0x446   :  { %v2375_v52 = vadd.f32 %v2374_v54, %v2373_v0 }
 0x448   :  { %v2376_v20 = vrot.slane %v2375_v52, 4 }
 0x44a   :  { %v2377_v47 = vadd.f32 %v2376_v20, %v2375_v52 }
 0x44c   :  { %v2378_v36 = vrot.slane %v2377_v47, 2 }
 0x44e   :  { %v2379_v1 = vadd.f32 %v2378_v36, %v2377_v47 }
 0x450   :  { %v2380_v61 = vrot.slane %v2379_v1, 1 }
 0x452   :  { %v2381_v5 = vadd.f32 %v2380_v61, %v2379_v1 }
 0x454   :  { %v2382_v10 = vmul.f32 0.013888889, %v2381_v5 }
 0x456   :  { %v2383_v12 = vadd.f32 1e-05, %v2382_v10 }
 0x458   :  { %3384 = vrsqrt.f32 %v2383_v12 }
 0x465   :  { %v3385_v42 = vpop.eup %3384 }
 0x466   :  { %v2385_v6 = vmul.f32 %v3385_v42, %v2341_v22  ;;  %v2386_v27 = vmul.f32 %v3385_v42, %v2342_v11  ;;  %v2387_v51 = vmul.f32 %v3385_v42, %v2343_v17  ;;  %v2388_v13 = vmul.f32 %v3385_v42, %v2344_v9 }
 0x467   :  { %v2389_v49 = vmul.f32 %v3385_v42, %v2345_v24  ;;  %v2390_v40 = vmul.f32 %v3385_v42, %v2346_v56  ;;  %v2391_v43 = vmul.f32 %v3385_v42, %v2347_v38  ;;  %v2392_v41 = vmul.f32 %v3385_v42, %v2348_v30 }
 0x468   :  { %v2393_v15 = vmul.f32 %v3385_v42, %v2349_v28  ;;  %v2401_v7 = vmul.f32 %v2953_v33, %v2385_v6  ;;  %v2402_v19 = vmul.f32 %v2953_v33, %v2386_v27  ;;  %v2403_v55 = vmul.f32 %v2953_v33, %v2387_v51 }
 0x469   :  { %v2404_v4 = vmul.f32 %v2953_v33, %v2388_v13  ;;  %v2405_v21 = vmul.f32 %v2953_v33, %v2389_v49  ;;  %v2406_v46 = vmul.f32 %v2953_v33, %v2390_v40  ;;  %v2407_v2 = vmul.f32 %v2953_v33, %v2391_v43 }
 0x46a   :  { %v2408_v31 = vmul.f32 %v2953_v33, %v2392_v41  ;;  %v2409_v22 = vmul.f32 %v2953_v33, %v2393_v15  ;;  %v2417_v11 = vadd.f32 %v2954_v14, %v2401_v7  ;;  %v2418_v17 = vadd.f32 %v2954_v14, %v2402_v19 }
 0x46b   :  { %v2419_v9 = vadd.f32 %v2954_v14, %v2403_v55  ;;  %v2420_v24 = vadd.f32 %v2954_v14, %v2404_v4  ;;  %v2421_v18 = vadd.f32 %v2954_v14, %v2405_v21  ;;  %v2422_v59 = vadd.f32 %v2954_v14, %v2406_v46 }
 0x46c   :  { %v2423_v3 = vadd.f32 %v2954_v14, %v2407_v2  ;;  %v2424_v56 = vadd.f32 %v2954_v14, %v2408_v31  ;;  %v2425_v35 = vadd.f32 %v2954_v14, %v2409_v22  ;;  %v2426_v8 = vmax.f32 %v2417_v11, 0.0 }
 0x46d   :  { %v2427_v44 = vmax.f32 %v2418_v17, 0.0  ;;  %v2428_v23 = vmax.f32 %v2419_v9, 0.0  ;;  %v2429_v38 = vmax.f32 %v2420_v24, 0.0  ;;  %v2430_v16 = vmax.f32 %v2421_v18, 0.0 }
 0x46e   :  { %v2431_v57 = vmax.f32 %v2422_v59, 0.0  ;;  %v2432_v25 = vmax.f32 %v2423_v3, 0.0  ;;  %v2433_v30 = vmax.f32 %v2424_v56, 0.0  ;;  %v2434_v29 = vmax.f32 %v2425_v35, 0.0 }
 0x46f   :  { %v2444_v58 = vcombine.high %v2426_v8, %v2426_v8  ;;  %v2451_v63 = vrot.slane %v2426_v8, %v4530_v48  ;;  %v2461_v28 = vcombine.high %v2427_v44, %v2427_v44  ;;  %v2468_v32 = vrot.slane %v2427_v44, %v4530_v48 }
 0x470   :  { %v2478_v37 = vcombine.high %v2428_v23, %v2428_v23  ;;  %v2485_v50 = vrot.slane %v2428_v23, %v4530_v48  ;;  %v2495_v34 = vcombine.high %v2429_v38, %v2429_v38  ;;  %v2502_v53 = vrot.slane %v2429_v38, %v4530_v48 }
 0x471   :  { %v2458_v39 = vrot.slane %v2444_v58, %v4530_v48  ;;  %v2459_v26 = vcombine.high %v2451_v63, %v2451_v63  ;;  %v2475_v60 = vrot.slane %v2461_v28, %v4530_v48  ;;  %v2476_v62 = vcombine.high %v2468_v32, %v2468_v32 }
 0x472   :  { %v2492_v45 = vrot.slane %v2478_v37, %v4530_v48  ;;  %v2493_v0 = vcombine.high %v2485_v50, %v2485_v50  ;;  %v2509_v54 = vrot.slane %v2495_v34, %v4530_v48  ;;  %v2510_v52 = vcombine.high %v2502_v53, %v2502_v53 }
 0x473   :  { %v2460_v20 = vcombine.high %v2458_v39, %v2458_v39  ;;  %v2477_v47 = vcombine.high %v2475_v60, %v2475_v60  ;;  %v2512_v36 = vcombine.high %v2430_v16, %v2430_v16  ;;  %v2519_v1 = vrot.slane %v2430_v16, %v4530_v48 }
 0x474   :  { %v2494_v61 = vcombine.high %v2492_v45, %v2492_v45  ;;  %v2511_v5 = vcombine.high %v2509_v54, %v2509_v54  ;;  %v2529_v10 = vcombine.high %v2431_v57, %v2431_v57  ;;  %v4724_v12 = vrot.slane %v2431_v57, %v4530_v48 }
 0x475   :  { %v2526_v42 = vrot.slane %v2512_v36, %v4530_v48  ;;  %v2527_v33 = vcombine.high %v2519_v1, %v2519_v1  ;;  %v2546_v6 = vcombine.high %v2432_v25, %v2432_v25  ;;  %v2553_v27 = vrot.slane %v2432_v25, %v4530_v48 }
 0x476   :  { %v2543_v51 = vrot.slane %v2529_v10, %v4530_v48  ;;  %v2544_v13 = vcombine.high %v4724_v12, %v4724_v12  ;;  %v2563_v49 = vcombine.high %v2433_v30, %v2433_v30  ;;  %v2570_v40 = vrot.slane %v2433_v30, %v4530_v48 }
 0x477   :  { %v2528_v43 = vcombine.high %v2526_v42, %v2526_v42  ;;  %v4733_v41 = vrot.slane %v2546_v6, %v4530_v48  ;;  %v2561_v14 = vcombine.high %v2553_v27, %v2553_v27  ;;  %v2580_v15 = vcombine.high %v2434_v29, %v2434_v29 }
 0x478   :  { %v2545_v7 = vcombine.high %v2543_v51, %v2543_v51  ;;  %v2577_v19 = vrot.slane %v2563_v49, %v4530_v48  ;;  %v2578_v55 = vcombine.high %v2570_v40, %v2570_v40  ;;  %v2587_v4 = vrot.slane %v2434_v29, %v4530_v48 }
 0x479   :  { %v2562_v21 = vcombine.high %v4733_v41, %v4733_v41  ;;  %v2594_v46 = vrot.slane %v2580_v15, %v4530_v48  ;;  %v2597_v2 = vcombine.low %v2451_v63, %v2459_v26  ;;  %v2611_v31 = vrot.slane %v2458_v39, %v4530_v48 }
 0x47a   :  { %v2579_v22 = vcombine.high %v2577_v19, %v2577_v19  ;;  %v2595_v11 = vcombine.high %v2587_v4, %v2587_v4  ;;  %v2613_v17 = vcombine.low %v2460_v20, %v2468_v32  ;;  %v2627_v9 = vrot.slane %v2476_v62, %v4530_v48 }
 0x47b   :  { %v2596_v24 = vcombine.high %v2594_v46, %v2594_v46  ;;  %v2604_v18 = vrot.slane %v2597_v2, %v4530_v48  ;;  %v2629_v59 = vcombine.low %v2475_v60, %v2477_v47  ;;  %v2643_v3 = vrot.slane %v2485_v50, %v4530_v48 }
 0x47c   :  { %v2620_v56 = vrot.slane %v2613_v17, %v4530_v48  ;;  %v2645_v35 = vcombine.low %v2493_v0, %v2492_v45  ;;  %v2659_v8 = vrot.slane %v2494_v61, %v4530_v48  ;;  %v2661_v44 = vcombine.low %v2502_v53, %v2510_v52 }
 0x47d   :  { %v2612_v23 = vcombine.low %v2604_v18, %v2611_v31  ;;  %v2636_v38 = vrot.slane %v2629_v59, %v4530_v48  ;;  %v2675_v16 = vrot.slane %v2509_v54, %v4530_v48  ;;  %v2677_v57 = vcombine.low %v2511_v5, %v2519_v1 }
 0x47e   :  { %v2628_v25 = vcombine.low %v2620_v56, %v2627_v9  ;;  %v2652_v30 = vrot.slane %v2645_v35, %v4530_v48  ;;  %v2668_v29 = vrot.slane %v2661_v44, %v4530_v48  ;;  %v2691_v58 = vrot.slane %v2527_v33, %v4530_v48 }
 0x47f   :  { %v2644_v63 = vcombine.low %v2636_v38, %v2643_v3  ;;  %v2684_v28 = vrot.slane %v2677_v57, %v4530_v48  ;;  %v2693_v32 = vcombine.low %v2526_v42, %v2528_v43  ;;  %v2707_v37 = vrot.slane %v4724_v12, %v4530_v48  ;;  %2802 = vst.msk [vmem:[%s4821_s7] sm:$0x3f] %vm2801_vm2, %v2612_v23 }
 0x480   :  { %v2660_v50 = vcombine.low %v2652_v30, %v2659_v8  ;;  %v2676_v34 = vcombine.low %v2668_v29, %v2675_v16  ;;  %v2709_v53 = vcombine.low %v2544_v13, %v2543_v51  ;;  %v2723_v39 = vrot.slane %v2545_v7, %v4530_v48  ;;  %2803 = vst.msk [vmem:[%s4821_s7 + $0x8] sm:$0x3f] %vm2801_vm2, %v2628_v25 }
 0x481   :  { %v2692_v26 = vcombine.low %v2684_v28, %v2691_v58  ;;  %v2700_v60 = vrot.slane %v2693_v32, %v4530_v48  ;;  %v2725_v62 = vcombine.low %v2553_v27, %v2561_v14  ;;  %v2739_v45 = vrot.slane %v4733_v41, %v4530_v48  ;;  %2804 = vst.msk [vmem:[%s4821_s7 + $0x10] sm:$0x3f] %vm2801_vm2, %v2644_v63 }
 0x482   :  { %v2716_v0 = vrot.slane %v2709_v53, %v4530_v48  ;;  %v2741_v54 = vcombine.low %v2562_v21, %v2570_v40  ;;  %v2755_v52 = vrot.slane %v2578_v55, %v4530_v48  ;;  %v2757_v20 = vcombine.low %v2577_v19, %v2579_v22  ;;  %2805 = vst.msk [vmem:[%s4821_s7 + $0x18] sm:$0x3f] %vm2801_vm2, %v2660_v50 }
 0x483   :  { %2806 = vst.msk [vmem:[%s4821_s7 + $0x20] sm:$0x3f] %vm2801_vm2, %v2676_v34  ;;  %v2708_v47 = vcombine.low %v2700_v60, %v2707_v37  ;;  %v2732_v36 = vrot.slane %v2725_v62, %v4530_v48  ;;  %v2771_v1 = vrot.slane %v2587_v4, %v4530_v48  ;;  %v2773_v61 = vcombine.low %v2595_v11, %v2594_v46 }
 0x484   :  { %2807 = vst.msk [vmem:[%s4821_s7 + $0x28] sm:$0x3f] %vm2801_vm2, %v2692_v26  ;;  %v2724_v5 = vcombine.low %v2716_v0, %v2723_v39  ;;  %v2748_v10 = vrot.slane %v2741_v54, %v4530_v48  ;;  %v2764_v12 = vrot.slane %v2757_v20, %v4530_v48  ;;  %v2787_v42 = vrot.slane %v2596_v24, %v4530_v48 }
 0x485   :  { %v2740_v33 = vcombine.low %v2732_v36, %v2739_v45  ;;  %v2780_v6 = vrot.slane %v2773_v61, %v4530_v48  ;;  %2808 = vst.msk [vmem:[%s4821_s7 + $0x30] sm:$0x3f] %vm2801_vm2, %v2708_v47 }
 0x486   :  { %v2756_v27 = vcombine.low %v2748_v10, %v2755_v52  ;;  %v2772_v51 = vcombine.low %v2764_v12, %v2771_v1  ;;  %2809 = vst.msk [vmem:[%s4821_s7 + $0x38] sm:$0x3f] %vm2801_vm2, %v2724_v5 }
 0x487   :  { %v2788_v13 = vcombine.low %v2780_v6, %v2787_v42  ;;  %2810 = vst.msk [vmem:[%s4821_s7 + $0x40] sm:$0x3f] %vm2801_vm2, %v2740_v33 }
 0x488   :  { %2811 = vst.msk [vmem:[%s4821_s7 + $0x48] sm:$0x3f] %vm2801_vm2, %v2756_v27  ;;  %2812 = vst.msk [vmem:[%s4821_s7 + $0x50] sm:$0x3f] %vm2801_vm2, %v2772_v51 }
 0x489   :  { %2813 = vst.msk [vmem:[%s4821_s7 + $0x58] sm:$0x3f] %vm2801_vm2, %v2788_v13 }

</bundles_post_ra>
